<compile_context>
chip_gen: v7x
topology: tpu7x:2x2x1
jax: 0.10.0
libtpu: 0.0.40
codegen_flags: <defaults>
</compile_context>

<pallas_src>
import functools

import numpy as np
import jax
import jax.numpy as jnp
from jax import lax
from jax.experimental import pallas as pl
from jax.experimental.pallas import tpu as pltpu

_EPS = 1e-5


# ----------------------------------------------------------------------------------
# Fused kernel: one batch element per grid step.
# Low-res activations: flat padded layout, row stride WL, halo PH/PW (host-padded).
# Full-res activations: flat padded layout, row stride WP = W2+2.
# ----------------------------------------------------------------------------------
def _fused_kernel(
    x_ref, skip_ref, dwp_ref, wupb_ref, u2l_ref, wcv_ref, bcv_ref, msk_ref,
    o_ref,
    xi_s, cat_s, mid_s, tap_s,
    *, C_IN, C_SKIP, C_OUT, id_ch, gc, sq_k, band_k,
    WL, SL, LSLAB, WP, START2, L2P):
  f32 = jnp.float32
  C_CAT = 2 * C_SKIP
  sq_p, b_p = sq_k // 2, band_k // 2
  n_sq = sq_k * sq_k
  EDGE = WP + 1   # width of the front/back halo strips of the full-res scratches

  # ---- zero the halo strips of the padded full-res scratches ----------------------
  # (unconditional: the batch grid axis is "parallel", so no program_id gating)
  cat_s[:, 0:START2] = jnp.zeros((C_CAT, START2), f32)
  cat_s[:, START2 + L2P:START2 + L2P + EDGE] = jnp.zeros((C_CAT, EDGE), f32)
  mid_s[:, 0:START2] = jnp.zeros((C_OUT, START2), f32)
  mid_s[:, START2 + L2P:START2 + L2P + EDGE] = jnp.zeros((C_OUT, EDGE), f32)

  # ---- Stage 1: InceptionDWConv2d --------------------------------------------------
  # x_ref is the host-zero-padded low-res input, so every depthwise tap is a plain
  # contiguous slice: no boundary masks, no in-kernel padding scratch.
  if id_ch > 0:
    xi_s[0:id_ch, :] = x_ref[0, 0:id_ch, SL:SL + LSLAB]

  def dw_branch(ch0, offsets, wcol0, bcol):
    # NOTE: statically unrolled (<= band_k taps at tiny gc); switch to
    # lax.fori_loop(unroll=True) at production tap/channel counts to bound
    # vreg live ranges.
    off0 = offsets[0]
    acc = dwp_ref[:, wcol0:wcol0 + 1] * \
        x_ref[0, ch0:ch0 + gc, SL + off0:SL + off0 + LSLAB]
    for t in range(1, len(offsets)):
      off = offsets[t]
      acc = acc + dwp_ref[:, wcol0 + t:wcol0 + t + 1] * \
          x_ref[0, ch0:ch0 + gc, SL + off:SL + off + LSLAB]
    xi_s[ch0:ch0 + gc, :] = jnp.maximum(acc + dwp_ref[:, bcol:bcol + 1], 0.0)

  if gc > 0:
    sq_off = [(di - sq_p) * WL + (dj - sq_p)
              for di in range(sq_k) for dj in range(sq_k)]
    wb_off = [dj - b_p for dj in range(band_k)]
    hb_off = [(di - b_p) * WL for di in range(band_k)]
    dw_branch(id_ch, sq_off, 0, n_sq + 2 * band_k)
    dw_branch(id_ch + gc, wb_off, n_sq, n_sq + 2 * band_k + 1)
    dw_branch(id_ch + 2 * gc, hb_off, n_sq + band_k, n_sq + 2 * band_k + 2)

  # ---- Stage 2: InterpConv ----------------------------------------------------------
  # 1x1 conv (+folded BN bias) at LOW resolution, then the whole 2x bilinear
  # upsample + layout change as ONE Kronecker matmul into the padded full-res
  # layout.  Upsample columns of real pixels sum to 1 (bias commutes); halo
  # columns of u2l are all-zero so the halo stays exactly 0; ReLU applied after
  # the upsample (numerically identical to the reference ordering).
  z = jnp.dot(wupb_ref[:, 0:C_IN], xi_s[...],
              preferred_element_type=f32) + wupb_ref[:, C_IN:C_IN + 1]
  up = jnp.dot(z, u2l_ref[...], preferred_element_type=f32)          # (C_SKIP, L2P)
  cat_s[0:C_SKIP, START2:START2 + L2P] = skip_ref[0]                 # torch.cat order
  cat_s[C_SKIP:C_CAT, START2:START2 + L2P] = jnp.maximum(up, 0.0)

  # ---- Stage 3: conv block = 2 x (3x3 conv + folded BN + ReLU) -----------------------
  # Each conv stacks its 9 shifted contiguous views into tap_s and issues a single
  # K = 9*C matmul on the MXU.
  def conv3x3(src_s, c_in, w):
    for t in range(9):
      off = (t // 3 - 1) * WP + (t % 3 - 1)
      tap_s[t * c_in:(t + 1) * c_in, :] = src_s[:, START2 + off:START2 + off + L2P]
    return jnp.dot(w, tap_s[0:9 * c_in, :], preferred_element_type=f32)

  y1 = conv3x3(cat_s, C_CAT, wcv_ref[:, 0:9 * C_CAT])
  # single residual mask multiply: re-zero the halo columns of the conv1 output so
  # conv2's taps read exact zeros at the image border.
  mid_s[:, START2:START2 + L2P] = (
      jnp.maximum(y1 + bcv_ref[:, 0:1], 0.0) * msk_ref[...])
  y2 = conv3x3(mid_s, C_OUT, wcv_ref[:, 9 * C_CAT:9 * (C_CAT + C_OUT)])
  # full-width lane-dense store in padded layout; host strips the 2 halo cols/row.
  o_ref[0] = jnp.maximum(y2 + bcv_ref[:, 1:2], 0.0)


# ----------------------------------------------------------------------------------
# Host-side helpers: BN folding, Kronecker bilinear matrix, packing, padding.
# ----------------------------------------------------------------------------------
def _fold_bn(w, bn):
  gamma, beta, mean, var = bn
  scale = gamma / jnp.sqrt(var + _EPS)
  w_f = w * scale.reshape((-1,) + (1,) * (w.ndim - 1))
  b_f = beta - mean * scale
  return w_f, b_f


def _bilinear_matrix(n):
  """(2n, n) 2x bilinear upsampling matrix (align_corners=False); rows sum to 1."""
  u = np.zeros((2 * n, n), np.float32)
  for o in range(2 * n):
    src = max((o + 0.5) / 2.0 - 0.5, 0.0)
    i0 = min(int(np.floor(src)), n - 1)
    i1 = min(i0 + 1, n - 1)
    lam = src - i0
    u[o, i0] += 1.0 - lam
    u[o, i1] += lam
  return u


def up_inception_conv_block(skip, x, params, *, sq_k=3, band_k=11,
                            branch_ratio=0.125):
  N, C_IN, H, W = x.shape
  Ns, C_SKIP, H2, W2 = skip.shape
  assert Ns == N and H2 == 2 * H and W2 == 2 * W
  gc = int(C_IN * branch_ratio)
  assert gc >= 1
  id_ch = C_IN - 3 * gc
  C_OUT = params["w_c1"].shape[0]
  C_CAT = 2 * C_SKIP
  sq_p, b_p = sq_k // 2, band_k // 2

  # -------- low-res padded ("halo") layout for x / inception -----------------------
  PH = PW = max(sq_p, b_p)
  WL = W + 2 * PW
  LL = (H + 2 * PH) * WL
  SL = PH * WL + PW                       # flat index of real pixel (0, 0)
  LSLAB = (H - 1) * WL + W                # first .. last real pixel (inclusive)

  # -------- full-res padded layout for concat / conv block / output ----------------
  WP = W2 + 2
  LP = (H2 + 2) * WP
  START2 = WP + 1
  L2P = H2 * WP                           # slab width computed / stored per channel

  # -------- fold inference BN into every conv --------------------------------------
  whw_f, bhw_f = _fold_bn(params["w_hw"], params["bn_hw"])
  wwb_f, bwb_f = _fold_bn(params["w_wb"], params["bn_wb"])
  whb_f, bhb_f = _fold_bn(params["w_hb"], params["bn_hb"])
  wup_f, bup_f = _fold_bn(params["w_up"], params["bn_up"])
  wc1_f, bc1_f = _fold_bn(params["w_c1"], params["bn_c1"])
  wc2_f, bc2_f = _fold_bn(params["w_c2"], params["bn_c2"])

  # -------- consolidated resident operands ------------------------------------------
  # depthwise weights + biases: (gc, sq_k^2 + 2*band_k + 3)
  dwp = jnp.concatenate([
      whw_f.reshape(gc, sq_k * sq_k),
      wwb_f.reshape(gc, band_k),
      whb_f.reshape(gc, band_k),
      bhw_f[:, None], bwb_f[:, None], bhb_f[:, None]], axis=1)
  # 1x1 conv weight + bias: (C_SKIP, C_IN + 1)
  wupb = jnp.concatenate([wup_f.reshape(C_SKIP, C_IN), bup_f[:, None]], axis=1)
  # 3x3 conv weights flattened for the K-stacked matmuls: (C_OUT, 9*(C_CAT + C_OUT))
  w1_p = jnp.transpose(wc1_f, (0, 2, 3, 1)).reshape(C_OUT, 9 * C_CAT)
  w2_p = jnp.transpose(wc2_f, (0, 2, 3, 1)).reshape(C_OUT, 9 * C_OUT)
  wcv = jnp.concatenate([w1_p, w2_p], axis=1)
  bcv = jnp.stack([bc1_f, bc2_f], axis=1)                            # (C_OUT, 2)

  # Kronecker bilinear upsample matrix: low-res slab coords -> padded full-res slab
  # coords (zero rows at low-res halo cols, zero cols at full-res halo cols).
  uh = _bilinear_matrix(H)                                           # (H2, H)
  uw = _bilinear_matrix(W)                                           # (W2, W)
  u4 = np.einsum('ri,cj->ijrc', uh, uw).astype(np.float32)           # (H, W, H2, W2)
  u2l = np.zeros((H, WL, H2, WP), np.float32)
  u2l[:, :W, :, :W2] = u4
  u2l = jnp.asarray(u2l.reshape(H * WL, H2 * WP)[:LSLAB])            # (LSLAB, L2P)

  # halo-column mask for the conv1 output (the single remaining mask)
  msk = np.zeros((1, H2, WP), np.float32)
  msk[:, :, :W2] = 1.0
  msk = jnp.asarray(msk.reshape(1, L2P))

  # -------- host-side zero-pad of the two activations (layout plumbing only) --------
  x_pad = jnp.pad(x, ((0, 0), (0, 0), (PH, PH), (PW, PW))).reshape(N, C_IN, LL)
  skip_pad = jnp.pad(skip, ((0, 0), (0, 0), (0, 0), (0, 2))).reshape(
      N, C_SKIP, L2P)

  kernel = functools.partial(
      _fused_kernel, C_IN=C_IN, C_SKIP=C_SKIP, C_OUT=C_OUT, id_ch=id_ch, gc=gc,
      sq_k=sq_k, band_k=band_k, WL=WL, SL=SL, LSLAB=LSLAB,
      WP=WP, START2=START2, L2P=L2P)

  def _full(a):
    nd = a.ndim
    return pl.BlockSpec(a.shape, lambda b, _nd=nd: (0,) * _nd)

  out_flat = pl.pallas_call(
      kernel,
      out_shape=jax.ShapeDtypeStruct((N, C_OUT, L2P), jnp.float32),
      grid=(N,),
      in_specs=[
          pl.BlockSpec((1, C_IN, LL), lambda b: (b, 0, 0)),
          pl.BlockSpec((1, C_SKIP, L2P), lambda b: (b, 0, 0)),
          _full(dwp), _full(wupb), _full(u2l), _full(wcv), _full(bcv), _full(msk),
      ],
      out_specs=pl.BlockSpec((1, C_OUT, L2P), lambda b: (b, 0, 0)),
      scratch_shapes=[
          pltpu.VMEM((C_IN, LSLAB), jnp.float32),                # inception output
          pltpu.VMEM((C_CAT, LP + 2), jnp.float32),              # concat, padded
          pltpu.VMEM((C_OUT, LP + 2), jnp.float32),              # conv1 out, padded
          pltpu.VMEM((9 * max(C_CAT, C_OUT), L2P), jnp.float32),  # stacked taps
      ],
      compiler_params=pltpu.CompilerParams(
          dimension_semantics=("parallel",)),
  )(x_pad, skip_pad, dwp, wupb, u2l, wcv, bcv, msk)

  return out_flat.reshape(N, C_OUT, H2, WP)[:, :, :, :W2]


# ----------------------------------------------------------------------------------
# main: deterministic toy inputs, run fused kernel, check against pure-JAX reference.
# ----------------------------------------------------------------------------------
if __name__ == "__main__":
  N, C_IN, H, W = 2, 8, 8, 8
  C_SKIP, C_OUT = 4, 4
  H2, W2 = 2 * H, 2 * W
  gc = int(C_IN * 0.125)            # 1
  id_ch = C_IN - 3 * gc             # 5

  keys = iter(jax.random.split(jax.random.PRNGKey(0), 40))

  def nrm(shape, s=0.3):
    return s * jax.random.normal(next(keys), shape, jnp.float32)

  def bn_params(c):
    gamma = 1.0 + 0.1 * jax.random.normal(next(keys), (c,), jnp.float32)
    beta = 0.1 * jax.random.normal(next(keys), (c,), jnp.float32)
    mean = 0.1 * jax.random.normal(next(keys), (c,), jnp.float32)
    var = jax.random.uniform(next(keys), (c,), jnp.float32, minval=0.5, maxval=1.5)
    return gamma, beta, mean, var

  x = nrm((N, C_IN, H, W), 1.0)
  skip = nrm((N, C_SKIP, H2, W2), 1.0)

  w_hw, bn_hw = nrm((gc, 1, 3, 3)), bn_params(gc)
  w_wb, bn_wb = nrm((gc, 1, 1, 11)), bn_params(gc)
  w_hb, bn_hb = nrm((gc, 1, 11, 1)), bn_params(gc)
  w_up, bn_up = nrm((C_SKIP, C_IN, 1, 1)), bn_params(C_SKIP)
  w_c1, bn_c1 = nrm((C_OUT, 2 * C_SKIP, 3, 3)), bn_params(C_OUT)
  w_c2, bn_c2 = nrm((C_OUT, C_OUT, 3, 3)), bn_params(C_OUT)

  params = dict(w_hw=w_hw, bn_hw=bn_hw, w_wb=w_wb, bn_wb=bn_wb,
                w_hb=w_hb, bn_hb=bn_hb, w_up=w_up, bn_up=bn_up,
                w_c1=w_c1, bn_c1=bn_c1, w_c2=w_c2, bn_c2=bn_c2)

  # -------------------- fused Pallas forward --------------------
  out = jax.block_until_ready(up_inception_conv_block(skip, x, params))

  # -------------------- pure-JAX reference --------------------
  def cbr(inp, w, bn, padding, groups=1):
    y = lax.conv_general_dilated(inp, w, (1, 1), padding,
                                 dimension_numbers=('NCHW', 'OIHW', 'NCHW'),
                                 feature_group_count=groups)
    gamma, beta, mean, var = bn
    s = (gamma / jnp.sqrt(var + _EPS)).reshape(1, -1, 1, 1)
    b = (beta - mean * gamma / jnp.sqrt(var + _EPS)).reshape(1, -1, 1, 1)
    return jnp.maximum(y * s + b, 0.0)

  def forward_ref(skip, x):
    x_id = x[:, :id_ch]
    y_hw = cbr(x[:, id_ch:id_ch + gc], w_hw, bn_hw, [(1, 1), (1, 1)], groups=gc)
    y_w = cbr(x[:, id_ch + gc:id_ch + 2 * gc], w_wb, bn_wb, [(0, 0), (5, 5)], groups=gc)
    y_h = cbr(x[:, id_ch + 2 * gc:], w_hb, bn_hb, [(5, 5), (0, 0)], groups=gc)
    xi = jnp.concatenate([x_id, y_hw, y_w, y_h], axis=1)

    def idx(size):
      o = jnp.arange(2 * size, dtype=jnp.float32)
      src = jnp.maximum((o + 0.5) / 2.0 - 0.5, 0.0)
      i0 = jnp.floor(src).astype(jnp.int32)
      i1 = jnp.minimum(i0 + 1, size - 1)
      lam = src - i0.astype(jnp.float32)
      return i0, i1, lam

    i0h, i1h, lh = idx(H)
    i0w, i1w, lw = idx(W)
    xh = xi[:, :, i0h, :] * (1 - lh)[None, None, :, None] + \
         xi[:, :, i1h, :] * lh[None, None, :, None]
    xu = xh[:, :, :, i0w] * (1 - lw)[None, None, None, :] + \
         xh[:, :, :, i1w] * lw[None, None, None, :]
    xu = cbr(xu, w_up, bn_up, [(0, 0), (0, 0)])
    c = jnp.concatenate([skip, xu], axis=1)
    y = cbr(c, w_c1, bn_c1, [(1, 1), (1, 1)])
    y = cbr(y, w_c2, bn_c2, [(1, 1), (1, 1)])
    return y

  ref = jax.block_until_ready(forward_ref(skip, x))
  err = float(jnp.max(jnp.abs(out - ref)))
  assert out.shape == (N, C_OUT, H2, W2), out.shape
  assert err < 1e-4, f"max abs err {err}"
  print("KERNEL_OK")
</pallas_src>

<mosaic_0001>
module attributes {stable_mosaic.version = 11 : i64} {
  func.func @_fused_kernel(%arg0: i32, %arg1: memref<1x8x324xf32, #tpu.memory_space<vmem>>, %arg2: memref<1x4x288xf32, #tpu.memory_space<vmem>>, %arg3: memref<1x34xf32, #tpu.memory_space<vmem>>, %arg4: memref<4x9xf32, #tpu.memory_space<vmem>>, %arg5: memref<134x288xf32, #tpu.memory_space<vmem>>, %arg6: memref<4x108xf32, #tpu.memory_space<vmem>>, %arg7: memref<4x2xf32, #tpu.memory_space<vmem>>, %arg8: memref<1x288xf32, #tpu.memory_space<vmem>>, %arg9: memref<1x4x288xf32, #tpu.memory_space<vmem>>, %arg10: memref<8x134xf32, #tpu.memory_space<vmem>>, %arg11: memref<8x326xf32, #tpu.memory_space<vmem>>, %arg12: memref<4x326xf32, #tpu.memory_space<vmem>>, %arg13: memref<72x288xf32, #tpu.memory_space<vmem>>) attributes {dimension_semantics = [#tpu.dimension_semantics<parallel>], iteration_bounds = array<i64: 2>, scalar_prefetch = 0 : i64, scratch_operands = 4 : i64, tpu.core_type = #tpu.core_type<tc>, window_params = [{transform_indices = @transform_0, window_bounds = array<i64: 1, 8, 324>}, {transform_indices = @transform_1, window_bounds = array<i64: 1, 4, 288>}, {pipeline_mode = #tpu.pipeline_mode<synchronous>, transform_indices = @transform_2, window_bounds = array<i64: 1, 34>}, {pipeline_mode = #tpu.pipeline_mode<synchronous>, transform_indices = @transform_3, window_bounds = array<i64: 4, 9>}, {pipeline_mode = #tpu.pipeline_mode<synchronous>, transform_indices = @transform_4, window_bounds = array<i64: 134, 288>}, {pipeline_mode = #tpu.pipeline_mode<synchronous>, transform_indices = @transform_5, window_bounds = array<i64: 4, 108>}, {pipeline_mode = #tpu.pipeline_mode<synchronous>, transform_indices = @transform_6, window_bounds = array<i64: 4, 2>}, {pipeline_mode = #tpu.pipeline_mode<synchronous>, transform_indices = @transform_7, window_bounds = array<i64: 1, 288>}, {transform_indices = @transform_8, window_bounds = array<i64: 1, 4, 288>}]} {
    %cst = arith.constant 0.000000e+00 : f32
    %0 = vector.broadcast %cst : f32 to vector<8x19xf32>
    %c0 = arith.constant 0 : index
    %c0_0 = arith.constant 0 : index
    %1 = vector.load %arg11[%c0, %c0_0] : memref<8x326xf32, #tpu.memory_space<vmem>>, vector<8x19xf32>
    tpu.vector_store %arg11[%c0, %c0_0], %0 {strides = array<i32>} : memref<8x326xf32, #tpu.memory_space<vmem>>, vector<8x19xf32>,
    %cst_1 = arith.constant 0.000000e+00 : f32
    %2 = vector.broadcast %cst_1 : f32 to vector<8x19xf32>
    %c0_2 = arith.constant 0 : index
    %c307 = arith.constant 307 : index
    %3 = vector.load %arg11[%c0_2, %c307] : memref<8x326xf32, #tpu.memory_space<vmem>>, vector<8x19xf32>
    tpu.vector_store %arg11[%c0_2, %c307], %2 {strides = array<i32>} : memref<8x326xf32, #tpu.memory_space<vmem>>, vector<8x19xf32>,
    %cst_3 = arith.constant 0.000000e+00 : f32
    %4 = vector.broadcast %cst_3 : f32 to vector<4x19xf32>
    %c0_4 = arith.constant 0 : index
    %c0_5 = arith.constant 0 : index
    %5 = vector.load %arg12[%c0_4, %c0_5] : memref<4x326xf32, #tpu.memory_space<vmem>>, vector<4x19xf32>
    tpu.vector_store %arg12[%c0_4, %c0_5], %4 {strides = array<i32>} : memref<4x326xf32, #tpu.memory_space<vmem>>, vector<4x19xf32>,
    %cst_6 = arith.constant 0.000000e+00 : f32
    %6 = vector.broadcast %cst_6 : f32 to vector<4x19xf32>
    %c0_7 = arith.constant 0 : index
    %c307_8 = arith.constant 307 : index
    %7 = vector.load %arg12[%c0_7, %c307_8] : memref<4x326xf32, #tpu.memory_space<vmem>>, vector<4x19xf32>
    tpu.vector_store %arg12[%c0_7, %c307_8], %6 {strides = array<i32>} : memref<4x326xf32, #tpu.memory_space<vmem>>, vector<4x19xf32>,
    %c0_9 = arith.constant 0 : index
    %c0_10 = arith.constant 0 : index
    %c95 = arith.constant 95 : index
    %8 = vector.load %arg1[%c0_9, %c0_10, %c95] : memref<1x8x324xf32, #tpu.memory_space<vmem>>, vector<1x5x134xf32>
    %9 = vector.shape_cast %8 : vector<1x5x134xf32> to vector<5x134xf32>
    %c0_11 = arith.constant 0 : index
    %c0_12 = arith.constant 0 : index
    %10 = vector.load %arg10[%c0_11, %c0_12] : memref<8x134xf32, #tpu.memory_space<vmem>>, vector<5x134xf32>
    tpu.vector_store %arg10[%c0_11, %c0_12], %9 {strides = array<i32>} : memref<8x134xf32, #tpu.memory_space<vmem>>, vector<5x134xf32>,
    %c0_13 = arith.constant 0 : index
    %c0_14 = arith.constant 0 : index
    %11 = vector.load %arg3[%c0_13, %c0_14] : memref<1x34xf32, #tpu.memory_space<vmem>>, vector<1x1xf32>
    %c0_15 = arith.constant 0 : index
    %c5 = arith.constant 5 : index
    %c76 = arith.constant 76 : index
    %12 = vector.load %arg1[%c0_15, %c5, %c76] : memref<1x8x324xf32, #tpu.memory_space<vmem>>, vector<1x1x134xf32>
    %13 = vector.shape_cast %12 : vector<1x1x134xf32> to vector<1x134xf32>
    %14 = vector.broadcast %11 : vector<1x1xf32> to vector<1x134xf32>
    %15 = arith.mulf %14, %13 : vector<1x134xf32>
    %c0_16 = arith.constant 0 : index
    %c1 = arith.constant 1 : index
    %16 = vector.load %arg3[%c0_16, %c1] : memref<1x34xf32, #tpu.memory_space<vmem>>, vector<1x1xf32>
    %c0_17 = arith.constant 0 : index
    %c5_18 = arith.constant 5 : index
    %c77 = arith.constant 77 : index
    %17 = vector.load %arg1[%c0_17, %c5_18, %c77] : memref<1x8x324xf32, #tpu.memory_space<vmem>>, vector<1x1x134xf32>
    %18 = vector.shape_cast %17 : vector<1x1x134xf32> to vector<1x134xf32>
    %19 = vector.broadcast %16 : vector<1x1xf32> to vector<1x134xf32>
    %20 = arith.mulf %19, %18 : vector<1x134xf32>
    %21 = arith.addf %15, %20 : vector<1x134xf32>
    %c0_19 = arith.constant 0 : index
    %c2 = arith.constant 2 : index
    %22 = vector.load %arg3[%c0_19, %c2] : memref<1x34xf32, #tpu.memory_space<vmem>>, vector<1x1xf32>
    %c0_20 = arith.constant 0 : index
    %c5_21 = arith.constant 5 : index
    %c78 = arith.constant 78 : index
    %23 = vector.load %arg1[%c0_20, %c5_21, %c78] : memref<1x8x324xf32, #tpu.memory_space<vmem>>, vector<1x1x134xf32>
    %24 = vector.shape_cast %23 : vector<1x1x134xf32> to vector<1x134xf32>
    %25 = vector.broadcast %22 : vector<1x1xf32> to vector<1x134xf32>
    %26 = arith.mulf %25, %24 : vector<1x134xf32>
    %27 = arith.addf %21, %26 : vector<1x134xf32>
    %c0_22 = arith.constant 0 : index
    %c3 = arith.constant 3 : index
    %28 = vector.load %arg3[%c0_22, %c3] : memref<1x34xf32, #tpu.memory_space<vmem>>, vector<1x1xf32>
    %c0_23 = arith.constant 0 : index
    %c5_24 = arith.constant 5 : index
    %c94 = arith.constant 94 : index
    %29 = vector.load %arg1[%c0_23, %c5_24, %c94] : memref<1x8x324xf32, #tpu.memory_space<vmem>>, vector<1x1x134xf32>
    %30 = vector.shape_cast %29 : vector<1x1x134xf32> to vector<1x134xf32>
    %31 = vector.broadcast %28 : vector<1x1xf32> to vector<1x134xf32>
    %32 = arith.mulf %31, %30 : vector<1x134xf32>
    %33 = arith.addf %27, %32 : vector<1x134xf32>
    %c0_25 = arith.constant 0 : index
    %c4 = arith.constant 4 : index
    %34 = vector.load %arg3[%c0_25, %c4] : memref<1x34xf32, #tpu.memory_space<vmem>>, vector<1x1xf32>
    %c0_26 = arith.constant 0 : index
    %c5_27 = arith.constant 5 : index
    %c95_28 = arith.constant 95 : index
    %35 = vector.load %arg1[%c0_26, %c5_27, %c95_28] : memref<1x8x324xf32, #tpu.memory_space<vmem>>, vector<1x1x134xf32>
    %36 = vector.shape_cast %35 : vector<1x1x134xf32> to vector<1x134xf32>
    %37 = vector.broadcast %34 : vector<1x1xf32> to vector<1x134xf32>
    %38 = arith.mulf %37, %36 : vector<1x134xf32>
    %39 = arith.addf %33, %38 : vector<1x134xf32>
    %c0_29 = arith.constant 0 : index
    %c5_30 = arith.constant 5 : index
    %40 = vector.load %arg3[%c0_29, %c5_30] : memref<1x34xf32, #tpu.memory_space<vmem>>, vector<1x1xf32>
    %c0_31 = arith.constant 0 : index
    %c5_32 = arith.constant 5 : index
    %c96 = arith.constant 96 : index
    %41 = vector.load %arg1[%c0_31, %c5_32, %c96] : memref<1x8x324xf32, #tpu.memory_space<vmem>>, vector<1x1x134xf32>
    %42 = vector.shape_cast %41 : vector<1x1x134xf32> to vector<1x134xf32>
    %43 = vector.broadcast %40 : vector<1x1xf32> to vector<1x134xf32>
    %44 = arith.mulf %43, %42 : vector<1x134xf32>
    %45 = arith.addf %39, %44 : vector<1x134xf32>
    %c0_33 = arith.constant 0 : index
    %c6 = arith.constant 6 : index
    %46 = vector.load %arg3[%c0_33, %c6] : memref<1x34xf32, #tpu.memory_space<vmem>>, vector<1x1xf32>
    %c0_34 = arith.constant 0 : index
    %c5_35 = arith.constant 5 : index
    %c112 = arith.constant 112 : index
    %47 = vector.load %arg1[%c0_34, %c5_35, %c112] : memref<1x8x324xf32, #tpu.memory_space<vmem>>, vector<1x1x134xf32>
    %48 = vector.shape_cast %47 : vector<1x1x134xf32> to vector<1x134xf32>
    %49 = vector.broadcast %46 : vector<1x1xf32> to vector<1x134xf32>
    %50 = arith.mulf %49, %48 : vector<1x134xf32>
    %51 = arith.addf %45, %50 : vector<1x134xf32>
    %c0_36 = arith.constant 0 : index
    %c7 = arith.constant 7 : index
    %52 = vector.load %arg3[%c0_36, %c7] : memref<1x34xf32, #tpu.memory_space<vmem>>, vector<1x1xf32>
    %c0_37 = arith.constant 0 : index
    %c5_38 = arith.constant 5 : index
    %c113 = arith.constant 113 : index
    %53 = vector.load %arg1[%c0_37, %c5_38, %c113] : memref<1x8x324xf32, #tpu.memory_space<vmem>>, vector<1x1x134xf32>
    %54 = vector.shape_cast %53 : vector<1x1x134xf32> to vector<1x134xf32>
    %55 = vector.broadcast %52 : vector<1x1xf32> to vector<1x134xf32>
    %56 = arith.mulf %55, %54 : vector<1x134xf32>
    %57 = arith.addf %51, %56 : vector<1x134xf32>
    %c0_39 = arith.constant 0 : index
    %c8 = arith.constant 8 : index
    %58 = vector.load %arg3[%c0_39, %c8] : memref<1x34xf32, #tpu.memory_space<vmem>>, vector<1x1xf32>
    %c0_40 = arith.constant 0 : index
    %c5_41 = arith.constant 5 : index
    %c114 = arith.constant 114 : index
    %59 = vector.load %arg1[%c0_40, %c5_41, %c114] : memref<1x8x324xf32, #tpu.memory_space<vmem>>, vector<1x1x134xf32>
    %60 = vector.shape_cast %59 : vector<1x1x134xf32> to vector<1x134xf32>
    %61 = vector.broadcast %58 : vector<1x1xf32> to vector<1x134xf32>
    %62 = arith.mulf %61, %60 : vector<1x134xf32>
    %63 = arith.addf %57, %62 : vector<1x134xf32>
    %c0_42 = arith.constant 0 : index
    %c31 = arith.constant 31 : index
    %64 = vector.load %arg3[%c0_42, %c31] : memref<1x34xf32, #tpu.memory_space<vmem>>, vector<1x1xf32>
    %65 = vector.broadcast %64 : vector<1x1xf32> to vector<1x134xf32>
    %66 = arith.addf %63, %65 : vector<1x134xf32>
    %cst_43 = arith.constant 0.000000e+00 : f32
    %67 = vector.broadcast %cst_43 : f32 to vector<1x134xf32>
    %68 = arith.maximumf %66, %67 : vector<1x134xf32>
    %c5_44 = arith.constant 5 : index
    %c0_45 = arith.constant 0 : index
    %69 = vector.load %arg10[%c5_44, %c0_45] : memref<8x134xf32, #tpu.memory_space<vmem>>, vector<1x134xf32>
    tpu.vector_store %arg10[%c5_44, %c0_45], %68 {strides = array<i32>} : memref<8x134xf32, #tpu.memory_space<vmem>>, vector<1x134xf32>,
    %c0_46 = arith.constant 0 : index
    %c9 = arith.constant 9 : index
    %70 = vector.load %arg3[%c0_46, %c9] : memref<1x34xf32, #tpu.memory_space<vmem>>, vector<1x1xf32>
    %c0_47 = arith.constant 0 : index
    %c6_48 = arith.constant 6 : index
    %c90 = arith.constant 90 : index
    %71 = vector.load %arg1[%c0_47, %c6_48, %c90] : memref<1x8x324xf32, #tpu.memory_space<vmem>>, vector<1x1x134xf32>
    %72 = vector.shape_cast %71 : vector<1x1x134xf32> to vector<1x134xf32>
    %73 = vector.broadcast %70 : vector<1x1xf32> to vector<1x134xf32>
    %74 = arith.mulf %73, %72 : vector<1x134xf32>
    %c0_49 = arith.constant 0 : index
    %c10 = arith.constant 10 : index
    %75 = vector.load %arg3[%c0_49, %c10] : memref<1x34xf32, #tpu.memory_space<vmem>>, vector<1x1xf32>
    %c0_50 = arith.constant 0 : index
    %c6_51 = arith.constant 6 : index
    %c91 = arith.constant 91 : index
    %76 = vector.load %arg1[%c0_50, %c6_51, %c91] : memref<1x8x324xf32, #tpu.memory_space<vmem>>, vector<1x1x134xf32>
    %77 = vector.shape_cast %76 : vector<1x1x134xf32> to vector<1x134xf32>
    %78 = vector.broadcast %75 : vector<1x1xf32> to vector<1x134xf32>
    %79 = arith.mulf %78, %77 : vector<1x134xf32>
    %80 = arith.addf %74, %79 : vector<1x134xf32>
    %c0_52 = arith.constant 0 : index
    %c11 = arith.constant 11 : index
    %81 = vector.load %arg3[%c0_52, %c11] : memref<1x34xf32, #tpu.memory_space<vmem>>, vector<1x1xf32>
    %c0_53 = arith.constant 0 : index
    %c6_54 = arith.constant 6 : index
    %c92 = arith.constant 92 : index
    %82 = vector.load %arg1[%c0_53, %c6_54, %c92] : memref<1x8x324xf32, #tpu.memory_space<vmem>>, vector<1x1x134xf32>
    %83 = vector.shape_cast %82 : vector<1x1x134xf32> to vector<1x134xf32>
    %84 = vector.broadcast %81 : vector<1x1xf32> to vector<1x134xf32>
    %85 = arith.mulf %84, %83 : vector<1x134xf32>
    %86 = arith.addf %80, %85 : vector<1x134xf32>
    %c0_55 = arith.constant 0 : index
    %c12 = arith.constant 12 : index
    %87 = vector.load %arg3[%c0_55, %c12] : memref<1x34xf32, #tpu.memory_space<vmem>>, vector<1x1xf32>
    %c0_56 = arith.constant 0 : index
    %c6_57 = arith.constant 6 : index
    %c93 = arith.constant 93 : index
    %88 = vector.load %arg1[%c0_56, %c6_57, %c93] : memref<1x8x324xf32, #tpu.memory_space<vmem>>, vector<1x1x134xf32>
    %89 = vector.shape_cast %88 : vector<1x1x134xf32> to vector<1x134xf32>
    %90 = vector.broadcast %87 : vector<1x1xf32> to vector<1x134xf32>
    %91 = arith.mulf %90, %89 : vector<1x134xf32>
    %92 = arith.addf %86, %91 : vector<1x134xf32>
    %c0_58 = arith.constant 0 : index
    %c13 = arith.constant 13 : index
    %93 = vector.load %arg3[%c0_58, %c13] : memref<1x34xf32, #tpu.memory_space<vmem>>, vector<1x1xf32>
    %c0_59 = arith.constant 0 : index
    %c6_60 = arith.constant 6 : index
    %c94_61 = arith.constant 94 : index
    %94 = vector.load %arg1[%c0_59, %c6_60, %c94_61] : memref<1x8x324xf32, #tpu.memory_space<vmem>>, vector<1x1x134xf32>
    %95 = vector.shape_cast %94 : vector<1x1x134xf32> to vector<1x134xf32>
    %96 = vector.broadcast %93 : vector<1x1xf32> to vector<1x134xf32>
    %97 = arith.mulf %96, %95 : vector<1x134xf32>
    %98 = arith.addf %92, %97 : vector<1x134xf32>
    %c0_62 = arith.constant 0 : index
    %c14 = arith.constant 14 : index
    %99 = vector.load %arg3[%c0_62, %c14] : memref<1x34xf32, #tpu.memory_space<vmem>>, vector<1x1xf32>
    %c0_63 = arith.constant 0 : index
    %c6_64 = arith.constant 6 : index
    %c95_65 = arith.constant 95 : index
    %100 = vector.load %arg1[%c0_63, %c6_64, %c95_65] : memref<1x8x324xf32, #tpu.memory_space<vmem>>, vector<1x1x134xf32>
    %101 = vector.shape_cast %100 : vector<1x1x134xf32> to vector<1x134xf32>
    %102 = vector.broadcast %99 : vector<1x1xf32> to vector<1x134xf32>
    %103 = arith.mulf %102, %101 : vector<1x134xf32>
    %104 = arith.addf %98, %103 : vector<1x134xf32>
    %c0_66 = arith.constant 0 : index
    %c15 = arith.constant 15 : index
    %105 = vector.load %arg3[%c0_66, %c15] : memref<1x34xf32, #tpu.memory_space<vmem>>, vector<1x1xf32>
    %c0_67 = arith.constant 0 : index
    %c6_68 = arith.constant 6 : index
    %c96_69 = arith.constant 96 : index
    %106 = vector.load %arg1[%c0_67, %c6_68, %c96_69] : memref<1x8x324xf32, #tpu.memory_space<vmem>>, vector<1x1x134xf32>
    %107 = vector.shape_cast %106 : vector<1x1x134xf32> to vector<1x134xf32>
    %108 = vector.broadcast %105 : vector<1x1xf32> to vector<1x134xf32>
    %109 = arith.mulf %108, %107 : vector<1x134xf32>
    %110 = arith.addf %104, %109 : vector<1x134xf32>
    %c0_70 = arith.constant 0 : index
    %c16 = arith.constant 16 : index
    %111 = vector.load %arg3[%c0_70, %c16] : memref<1x34xf32, #tpu.memory_space<vmem>>, vector<1x1xf32>
    %c0_71 = arith.constant 0 : index
    %c6_72 = arith.constant 6 : index
    %c97 = arith.constant 97 : index
    %112 = vector.load %arg1[%c0_71, %c6_72, %c97] : memref<1x8x324xf32, #tpu.memory_space<vmem>>, vector<1x1x134xf32>
    %113 = vector.shape_cast %112 : vector<1x1x134xf32> to vector<1x134xf32>
    %114 = vector.broadcast %111 : vector<1x1xf32> to vector<1x134xf32>
    %115 = arith.mulf %114, %113 : vector<1x134xf32>
    %116 = arith.addf %110, %115 : vector<1x134xf32>
    %c0_73 = arith.constant 0 : index
    %c17 = arith.constant 17 : index
    %117 = vector.load %arg3[%c0_73, %c17] : memref<1x34xf32, #tpu.memory_space<vmem>>, vector<1x1xf32>
    %c0_74 = arith.constant 0 : index
    %c6_75 = arith.constant 6 : index
    %c98 = arith.constant 98 : index
    %118 = vector.load %arg1[%c0_74, %c6_75, %c98] : memref<1x8x324xf32, #tpu.memory_space<vmem>>, vector<1x1x134xf32>
    %119 = vector.shape_cast %118 : vector<1x1x134xf32> to vector<1x134xf32>
    %120 = vector.broadcast %117 : vector<1x1xf32> to vector<1x134xf32>
    %121 = arith.mulf %120, %119 : vector<1x134xf32>
    %122 = arith.addf %116, %121 : vector<1x134xf32>
    %c0_76 = arith.constant 0 : index
    %c18 = arith.constant 18 : index
    %123 = vector.load %arg3[%c0_76, %c18] : memref<1x34xf32, #tpu.memory_space<vmem>>, vector<1x1xf32>
    %c0_77 = arith.constant 0 : index
    %c6_78 = arith.constant 6 : index
    %c99 = arith.constant 99 : index
    %124 = vector.load %arg1[%c0_77, %c6_78, %c99] : memref<1x8x324xf32, #tpu.memory_space<vmem>>, vector<1x1x134xf32>
    %125 = vector.shape_cast %124 : vector<1x1x134xf32> to vector<1x134xf32>
    %126 = vector.broadcast %123 : vector<1x1xf32> to vector<1x134xf32>
    %127 = arith.mulf %126, %125 : vector<1x134xf32>
    %128 = arith.addf %122, %127 : vector<1x134xf32>
    %c0_79 = arith.constant 0 : index
    %c19 = arith.constant 19 : index
    %129 = vector.load %arg3[%c0_79, %c19] : memref<1x34xf32, #tpu.memory_space<vmem>>, vector<1x1xf32>
    %c0_80 = arith.constant 0 : index
    %c6_81 = arith.constant 6 : index
    %c100 = arith.constant 100 : index
    %130 = vector.load %arg1[%c0_80, %c6_81, %c100] : memref<1x8x324xf32, #tpu.memory_space<vmem>>, vector<1x1x134xf32>
    %131 = vector.shape_cast %130 : vector<1x1x134xf32> to vector<1x134xf32>
    %132 = vector.broadcast %129 : vector<1x1xf32> to vector<1x134xf32>
    %133 = arith.mulf %132, %131 : vector<1x134xf32>
    %134 = arith.addf %128, %133 : vector<1x134xf32>
    %c0_82 = arith.constant 0 : index
    %c32 = arith.constant 32 : index
    %135 = vector.load %arg3[%c0_82, %c32] : memref<1x34xf32, #tpu.memory_space<vmem>>, vector<1x1xf32>
    %136 = vector.broadcast %135 : vector<1x1xf32> to vector<1x134xf32>
    %137 = arith.addf %134, %136 : vector<1x134xf32>
    %cst_83 = arith.constant 0.000000e+00 : f32
    %138 = vector.broadcast %cst_83 : f32 to vector<1x134xf32>
    %139 = arith.maximumf %137, %138 : vector<1x134xf32>
    %c6_84 = arith.constant 6 : index
    %c0_85 = arith.constant 0 : index
    %140 = vector.load %arg10[%c6_84, %c0_85] : memref<8x134xf32, #tpu.memory_space<vmem>>, vector<1x134xf32>
    tpu.vector_store %arg10[%c6_84, %c0_85], %139 {strides = array<i32>} : memref<8x134xf32, #tpu.memory_space<vmem>>, vector<1x134xf32>,
    %c0_86 = arith.constant 0 : index
    %c20 = arith.constant 20 : index
    %141 = vector.load %arg3[%c0_86, %c20] : memref<1x34xf32, #tpu.memory_space<vmem>>, vector<1x1xf32>
    %c0_87 = arith.constant 0 : index
    %c7_88 = arith.constant 7 : index
    %c5_89 = arith.constant 5 : index
    %142 = vector.load %arg1[%c0_87, %c7_88, %c5_89] : memref<1x8x324xf32, #tpu.memory_space<vmem>>, vector<1x1x134xf32>
    %143 = vector.shape_cast %142 : vector<1x1x134xf32> to vector<1x134xf32>
    %144 = vector.broadcast %141 : vector<1x1xf32> to vector<1x134xf32>
    %145 = arith.mulf %144, %143 : vector<1x134xf32>
    %c0_90 = arith.constant 0 : index
    %c21 = arith.constant 21 : index
    %146 = vector.load %arg3[%c0_90, %c21] : memref<1x34xf32, #tpu.memory_space<vmem>>, vector<1x1xf32>
    %c0_91 = arith.constant 0 : index
    %c7_92 = arith.constant 7 : index
    %c23 = arith.constant 23 : index
    %147 = vector.load %arg1[%c0_91, %c7_92, %c23] : memref<1x8x324xf32, #tpu.memory_space<vmem>>, vector<1x1x134xf32>
    %148 = vector.shape_cast %147 : vector<1x1x134xf32> to vector<1x134xf32>
    %149 = vector.broadcast %146 : vector<1x1xf32> to vector<1x134xf32>
    %150 = arith.mulf %149, %148 : vector<1x134xf32>
    %151 = arith.addf %145, %150 : vector<1x134xf32>
    %c0_93 = arith.constant 0 : index
    %c22 = arith.constant 22 : index
    %152 = vector.load %arg3[%c0_93, %c22] : memref<1x34xf32, #tpu.memory_space<vmem>>, vector<1x1xf32>
    %c0_94 = arith.constant 0 : index
    %c7_95 = arith.constant 7 : index
    %c41 = arith.constant 41 : index
    %153 = vector.load %arg1[%c0_94, %c7_95, %c41] : memref<1x8x324xf32, #tpu.memory_space<vmem>>, vector<1x1x134xf32>
    %154 = vector.shape_cast %153 : vector<1x1x134xf32> to vector<1x134xf32>
    %155 = vector.broadcast %152 : vector<1x1xf32> to vector<1x134xf32>
    %156 = arith.mulf %155, %154 : vector<1x134xf32>
    %157 = arith.addf %151, %156 : vector<1x134xf32>
    %c0_96 = arith.constant 0 : index
    %c23_97 = arith.constant 23 : index
    %158 = vector.load %arg3[%c0_96, %c23_97] : memref<1x34xf32, #tpu.memory_space<vmem>>, vector<1x1xf32>
    %c0_98 = arith.constant 0 : index
    %c7_99 = arith.constant 7 : index
    %c59 = arith.constant 59 : index
    %159 = vector.load %arg1[%c0_98, %c7_99, %c59] : memref<1x8x324xf32, #tpu.memory_space<vmem>>, vector<1x1x134xf32>
    %160 = vector.shape_cast %159 : vector<1x1x134xf32> to vector<1x134xf32>
    %161 = vector.broadcast %158 : vector<1x1xf32> to vector<1x134xf32>
    %162 = arith.mulf %161, %160 : vector<1x134xf32>
    %163 = arith.addf %157, %162 : vector<1x134xf32>
    %c0_100 = arith.constant 0 : index
    %c24 = arith.constant 24 : index
    %164 = vector.load %arg3[%c0_100, %c24] : memref<1x34xf32, #tpu.memory_space<vmem>>, vector<1x1xf32>
    %c0_101 = arith.constant 0 : index
    %c7_102 = arith.constant 7 : index
    %c77_103 = arith.constant 77 : index
    %165 = vector.load %arg1[%c0_101, %c7_102, %c77_103] : memref<1x8x324xf32, #tpu.memory_space<vmem>>, vector<1x1x134xf32>
    %166 = vector.shape_cast %165 : vector<1x1x134xf32> to vector<1x134xf32>
    %167 = vector.broadcast %164 : vector<1x1xf32> to vector<1x134xf32>
    %168 = arith.mulf %167, %166 : vector<1x134xf32>
    %169 = arith.addf %163, %168 : vector<1x134xf32>
    %c0_104 = arith.constant 0 : index
    %c25 = arith.constant 25 : index
    %170 = vector.load %arg3[%c0_104, %c25] : memref<1x34xf32, #tpu.memory_space<vmem>>, vector<1x1xf32>
    %c0_105 = arith.constant 0 : index
    %c7_106 = arith.constant 7 : index
    %c95_107 = arith.constant 95 : index
    %171 = vector.load %arg1[%c0_105, %c7_106, %c95_107] : memref<1x8x324xf32, #tpu.memory_space<vmem>>, vector<1x1x134xf32>
    %172 = vector.shape_cast %171 : vector<1x1x134xf32> to vector<1x134xf32>
    %173 = vector.broadcast %170 : vector<1x1xf32> to vector<1x134xf32>
    %174 = arith.mulf %173, %172 : vector<1x134xf32>
    %175 = arith.addf %169, %174 : vector<1x134xf32>
    %c0_108 = arith.constant 0 : index
    %c26 = arith.constant 26 : index
    %176 = vector.load %arg3[%c0_108, %c26] : memref<1x34xf32, #tpu.memory_space<vmem>>, vector<1x1xf32>
    %c0_109 = arith.constant 0 : index
    %c7_110 = arith.constant 7 : index
    %c113_111 = arith.constant 113 : index
    %177 = vector.load %arg1[%c0_109, %c7_110, %c113_111] : memref<1x8x324xf32, #tpu.memory_space<vmem>>, vector<1x1x134xf32>
    %178 = vector.shape_cast %177 : vector<1x1x134xf32> to vector<1x134xf32>
    %179 = vector.broadcast %176 : vector<1x1xf32> to vector<1x134xf32>
    %180 = arith.mulf %179, %178 : vector<1x134xf32>
    %181 = arith.addf %175, %180 : vector<1x134xf32>
    %c0_112 = arith.constant 0 : index
    %c27 = arith.constant 27 : index
    %182 = vector.load %arg3[%c0_112, %c27] : memref<1x34xf32, #tpu.memory_space<vmem>>, vector<1x1xf32>
    %c0_113 = arith.constant 0 : index
    %c7_114 = arith.constant 7 : index
    %c131 = arith.constant 131 : index
    %183 = vector.load %arg1[%c0_113, %c7_114, %c131] : memref<1x8x324xf32, #tpu.memory_space<vmem>>, vector<1x1x134xf32>
    %184 = vector.shape_cast %183 : vector<1x1x134xf32> to vector<1x134xf32>
    %185 = vector.broadcast %182 : vector<1x1xf32> to vector<1x134xf32>
    %186 = arith.mulf %185, %184 : vector<1x134xf32>
    %187 = arith.addf %181, %186 : vector<1x134xf32>
    %c0_115 = arith.constant 0 : index
    %c28 = arith.constant 28 : index
    %188 = vector.load %arg3[%c0_115, %c28] : memref<1x34xf32, #tpu.memory_space<vmem>>, vector<1x1xf32>
    %c0_116 = arith.constant 0 : index
    %c7_117 = arith.constant 7 : index
    %c149 = arith.constant 149 : index
    %189 = vector.load %arg1[%c0_116, %c7_117, %c149] : memref<1x8x324xf32, #tpu.memory_space<vmem>>, vector<1x1x134xf32>
    %190 = vector.shape_cast %189 : vector<1x1x134xf32> to vector<1x134xf32>
    %191 = vector.broadcast %188 : vector<1x1xf32> to vector<1x134xf32>
    %192 = arith.mulf %191, %190 : vector<1x134xf32>
    %193 = arith.addf %187, %192 : vector<1x134xf32>
    %c0_118 = arith.constant 0 : index
    %c29 = arith.constant 29 : index
    %194 = vector.load %arg3[%c0_118, %c29] : memref<1x34xf32, #tpu.memory_space<vmem>>, vector<1x1xf32>
    %c0_119 = arith.constant 0 : index
    %c7_120 = arith.constant 7 : index
    %c167 = arith.constant 167 : index
    %195 = vector.load %arg1[%c0_119, %c7_120, %c167] : memref<1x8x324xf32, #tpu.memory_space<vmem>>, vector<1x1x134xf32>
    %196 = vector.shape_cast %195 : vector<1x1x134xf32> to vector<1x134xf32>
    %197 = vector.broadcast %194 : vector<1x1xf32> to vector<1x134xf32>
    %198 = arith.mulf %197, %196 : vector<1x134xf32>
    %199 = arith.addf %193, %198 : vector<1x134xf32>
    %c0_121 = arith.constant 0 : index
    %c30 = arith.constant 30 : index
    %200 = vector.load %arg3[%c0_121, %c30] : memref<1x34xf32, #tpu.memory_space<vmem>>, vector<1x1xf32>
    %c0_122 = arith.constant 0 : index
    %c7_123 = arith.constant 7 : index
    %c185 = arith.constant 185 : index
    %201 = vector.load %arg1[%c0_122, %c7_123, %c185] : memref<1x8x324xf32, #tpu.memory_space<vmem>>, vector<1x1x134xf32>
    %202 = vector.shape_cast %201 : vector<1x1x134xf32> to vector<1x134xf32>
    %203 = vector.broadcast %200 : vector<1x1xf32> to vector<1x134xf32>
    %204 = arith.mulf %203, %202 : vector<1x134xf32>
    %205 = arith.addf %199, %204 : vector<1x134xf32>
    %c0_124 = arith.constant 0 : index
    %c33 = arith.constant 33 : index
    %206 = vector.load %arg3[%c0_124, %c33] : memref<1x34xf32, #tpu.memory_space<vmem>>, vector<1x1xf32>
    %207 = vector.broadcast %206 : vector<1x1xf32> to vector<1x134xf32>
    %208 = arith.addf %205, %207 : vector<1x134xf32>
    %cst_125 = arith.constant 0.000000e+00 : f32
    %209 = vector.broadcast %cst_125 : f32 to vector<1x134xf32>
    %210 = arith.maximumf %208, %209 : vector<1x134xf32>
    %c7_126 = arith.constant 7 : index
    %c0_127 = arith.constant 0 : index
    %211 = vector.load %arg10[%c7_126, %c0_127] : memref<8x134xf32, #tpu.memory_space<vmem>>, vector<1x134xf32>
    tpu.vector_store %arg10[%c7_126, %c0_127], %210 {strides = array<i32>} : memref<8x134xf32, #tpu.memory_space<vmem>>, vector<1x134xf32>,
    %c0_128 = arith.constant 0 : index
    %c0_129 = arith.constant 0 : index
    %212 = vector.load %arg4[%c0_128, %c0_129] : memref<4x9xf32, #tpu.memory_space<vmem>>, vector<4x8xf32>
    %c0_130 = arith.constant 0 : index
    %c0_131 = arith.constant 0 : index
    %213 = vector.load %arg10[%c0_130, %c0_131] : memref<8x134xf32, #tpu.memory_space<vmem>>, vector<8x134xf32>
    %cst_132 = arith.constant dense<0.000000e+00> : vector<4x134xf32>
    %214 = tpu.matmul %212, %213, %cst_132 {dimension_numbers = #tpu.dot_dimension_numbers<[1], [0], [0], [1], [0, 0, 1, 1], [], []>} : vector<4x8xf32>, vector<8x134xf32>, vector<4x134xf32> -> vector<4x134xf32>
    %c0_133 = arith.constant 0 : index
    %c8_134 = arith.constant 8 : index
    %215 = vector.load %arg4[%c0_133, %c8_134] : memref<4x9xf32, #tpu.memory_space<vmem>>, vector<4x1xf32>
    %216 = vector.broadcast %215 : vector<4x1xf32> to vector<4x134xf32>
    %217 = arith.addf %214, %216 : vector<4x134xf32>
    %c0_135 = arith.constant 0 : index
    %c0_136 = arith.constant 0 : index
    %218 = vector.load %arg5[%c0_135, %c0_136] : memref<134x288xf32, #tpu.memory_space<vmem>>, vector<134x288xf32>
    %cst_137 = arith.constant dense<0.000000e+00> : vector<4x288xf32>
    %219 = tpu.matmul %217, %218, %cst_137 {dimension_numbers = #tpu.dot_dimension_numbers<[1], [0], [0], [1], [0, 0, 1, 1], [], []>} : vector<4x134xf32>, vector<134x288xf32>, vector<4x288xf32> -> vector<4x288xf32>
    %c0_138 = arith.constant 0 : index
    %c0_139 = arith.constant 0 : index
    %c0_140 = arith.constant 0 : index
    %220 = vector.load %arg2[%c0_138, %c0_139, %c0_140] : memref<1x4x288xf32, #tpu.memory_space<vmem>>, vector<1x4x288xf32>
    %221 = vector.shape_cast %220 : vector<1x4x288xf32> to vector<4x288xf32>
    %c0_141 = arith.constant 0 : index
    %c19_142 = arith.constant 19 : index
    %222 = vector.load %arg11[%c0_141, %c19_142] : memref<8x326xf32, #tpu.memory_space<vmem>>, vector<4x288xf32>
    tpu.vector_store %arg11[%c0_141, %c19_142], %221 {strides = array<i32>} : memref<8x326xf32, #tpu.memory_space<vmem>>, vector<4x288xf32>,
    %cst_143 = arith.constant 0.000000e+00 : f32
    %223 = vector.broadcast %cst_143 : f32 to vector<4x288xf32>
    %224 = arith.maximumf %219, %223 : vector<4x288xf32>
    %c4_144 = arith.constant 4 : index
    %c19_145 = arith.constant 19 : index
    %225 = vector.load %arg11[%c4_144, %c19_145] : memref<8x326xf32, #tpu.memory_space<vmem>>, vector<4x288xf32>
    tpu.vector_store %arg11[%c4_144, %c19_145], %224 {strides = array<i32>} : memref<8x326xf32, #tpu.memory_space<vmem>>, vector<4x288xf32>,
    %c0_146 = arith.constant 0 : index
    %c0_147 = arith.constant 0 : index
    %226 = vector.load %arg6[%c0_146, %c0_147] : memref<4x108xf32, #tpu.memory_space<vmem>>, vector<4x72xf32>
    %c0_148 = arith.constant 0 : index
    %c0_149 = arith.constant 0 : index
    %227 = vector.load %arg11[%c0_148, %c0_149] : memref<8x326xf32, #tpu.memory_space<vmem>>, vector<8x288xf32>
    %c0_150 = arith.constant 0 : index
    %c0_151 = arith.constant 0 : index
    %228 = vector.load %arg13[%c0_150, %c0_151] : memref<72x288xf32, #tpu.memory_space<vmem>>, vector<8x288xf32>
    tpu.vector_store %arg13[%c0_150, %c0_151], %227 {strides = array<i32>} : memref<72x288xf32, #tpu.memory_space<vmem>>, vector<8x288xf32>,
    %c0_152 = arith.constant 0 : index
    %c1_153 = arith.constant 1 : index
    %229 = vector.load %arg11[%c0_152, %c1_153] : memref<8x326xf32, #tpu.memory_space<vmem>>, vector<8x288xf32>
    %c8_154 = arith.constant 8 : index
    %c0_155 = arith.constant 0 : index
    %230 = vector.load %arg13[%c8_154, %c0_155] : memref<72x288xf32, #tpu.memory_space<vmem>>, vector<8x288xf32>
    tpu.vector_store %arg13[%c8_154, %c0_155], %229 {strides = array<i32>} : memref<72x288xf32, #tpu.memory_space<vmem>>, vector<8x288xf32>,
    %c0_156 = arith.constant 0 : index
    %c2_157 = arith.constant 2 : index
    %231 = vector.load %arg11[%c0_156, %c2_157] : memref<8x326xf32, #tpu.memory_space<vmem>>, vector<8x288xf32>
    %c16_158 = arith.constant 16 : index
    %c0_159 = arith.constant 0 : index
    %232 = vector.load %arg13[%c16_158, %c0_159] : memref<72x288xf32, #tpu.memory_space<vmem>>, vector<8x288xf32>
    tpu.vector_store %arg13[%c16_158, %c0_159], %231 {strides = array<i32>} : memref<72x288xf32, #tpu.memory_space<vmem>>, vector<8x288xf32>,
    %c0_160 = arith.constant 0 : index
    %c18_161 = arith.constant 18 : index
    %233 = vector.load %arg11[%c0_160, %c18_161] : memref<8x326xf32, #tpu.memory_space<vmem>>, vector<8x288xf32>
    %c24_162 = arith.constant 24 : index
    %c0_163 = arith.constant 0 : index
    %234 = vector.load %arg13[%c24_162, %c0_163] : memref<72x288xf32, #tpu.memory_space<vmem>>, vector<8x288xf32>
    tpu.vector_store %arg13[%c24_162, %c0_163], %233 {strides = array<i32>} : memref<72x288xf32, #tpu.memory_space<vmem>>, vector<8x288xf32>,
    %c0_164 = arith.constant 0 : index
    %c19_165 = arith.constant 19 : index
    %235 = vector.load %arg11[%c0_164, %c19_165] : memref<8x326xf32, #tpu.memory_space<vmem>>, vector<8x288xf32>
    %c32_166 = arith.constant 32 : index
    %c0_167 = arith.constant 0 : index
    %236 = vector.load %arg13[%c32_166, %c0_167] : memref<72x288xf32, #tpu.memory_space<vmem>>, vector<8x288xf32>
    tpu.vector_store %arg13[%c32_166, %c0_167], %235 {strides = array<i32>} : memref<72x288xf32, #tpu.memory_space<vmem>>, vector<8x288xf32>,
    %c0_168 = arith.constant 0 : index
    %c20_169 = arith.constant 20 : index
    %237 = vector.load %arg11[%c0_168, %c20_169] : memref<8x326xf32, #tpu.memory_space<vmem>>, vector<8x288xf32>
    %c40 = arith.constant 40 : index
    %c0_170 = arith.constant 0 : index
    %238 = vector.load %arg13[%c40, %c0_170] : memref<72x288xf32, #tpu.memory_space<vmem>>, vector<8x288xf32>
    tpu.vector_store %arg13[%c40, %c0_170], %237 {strides = array<i32>} : memref<72x288xf32, #tpu.memory_space<vmem>>, vector<8x288xf32>,
    %c0_171 = arith.constant 0 : index
    %c36 = arith.constant 36 : index
    %239 = vector.load %arg11[%c0_171, %c36] : memref<8x326xf32, #tpu.memory_space<vmem>>, vector<8x288xf32>
    %c48 = arith.constant 48 : index
    %c0_172 = arith.constant 0 : index
    %240 = vector.load %arg13[%c48, %c0_172] : memref<72x288xf32, #tpu.memory_space<vmem>>, vector<8x288xf32>
    tpu.vector_store %arg13[%c48, %c0_172], %239 {strides = array<i32>} : memref<72x288xf32, #tpu.memory_space<vmem>>, vector<8x288xf32>,
    %c0_173 = arith.constant 0 : index
    %c37 = arith.constant 37 : index
    %241 = vector.load %arg11[%c0_173, %c37] : memref<8x326xf32, #tpu.memory_space<vmem>>, vector<8x288xf32>
    %c56 = arith.constant 56 : index
    %c0_174 = arith.constant 0 : index
    %242 = vector.load %arg13[%c56, %c0_174] : memref<72x288xf32, #tpu.memory_space<vmem>>, vector<8x288xf32>
    tpu.vector_store %arg13[%c56, %c0_174], %241 {strides = array<i32>} : memref<72x288xf32, #tpu.memory_space<vmem>>, vector<8x288xf32>,
    %c0_175 = arith.constant 0 : index
    %c38 = arith.constant 38 : index
    %243 = vector.load %arg11[%c0_175, %c38] : memref<8x326xf32, #tpu.memory_space<vmem>>, vector<8x288xf32>
    %c64 = arith.constant 64 : index
    %c0_176 = arith.constant 0 : index
    %244 = vector.load %arg13[%c64, %c0_176] : memref<72x288xf32, #tpu.memory_space<vmem>>, vector<8x288xf32>
    tpu.vector_store %arg13[%c64, %c0_176], %243 {strides = array<i32>} : memref<72x288xf32, #tpu.memory_space<vmem>>, vector<8x288xf32>,
    %c0_177 = arith.constant 0 : index
    %c0_178 = arith.constant 0 : index
    %245 = vector.load %arg13[%c0_177, %c0_178] : memref<72x288xf32, #tpu.memory_space<vmem>>, vector<72x288xf32>
    %cst_179 = arith.constant dense<0.000000e+00> : vector<4x288xf32>
    %246 = tpu.matmul %226, %245, %cst_179 {dimension_numbers = #tpu.dot_dimension_numbers<[1], [0], [0], [1], [0, 0, 1, 1], [], []>} : vector<4x72xf32>, vector<72x288xf32>, vector<4x288xf32> -> vector<4x288xf32>
    %c0_180 = arith.constant 0 : index
    %c0_181 = arith.constant 0 : index
    %247 = vector.load %arg7[%c0_180, %c0_181] : memref<4x2xf32, #tpu.memory_space<vmem>>, vector<4x1xf32>
    %248 = vector.broadcast %247 : vector<4x1xf32> to vector<4x288xf32>
    %249 = arith.addf %246, %248 : vector<4x288xf32>
    %cst_182 = arith.constant 0.000000e+00 : f32
    %250 = vector.broadcast %cst_182 : f32 to vector<4x288xf32>
    %251 = arith.maximumf %249, %250 : vector<4x288xf32>
    %c0_183 = arith.constant 0 : index
    %c0_184 = arith.constant 0 : index
    %252 = vector.load %arg8[%c0_183, %c0_184] : memref<1x288xf32, #tpu.memory_space<vmem>>, vector<1x288xf32>
    %253 = vector.broadcast %252 : vector<1x288xf32> to vector<4x288xf32>
    %254 = arith.mulf %251, %253 : vector<4x288xf32>
    %c0_185 = arith.constant 0 : index
    %c19_186 = arith.constant 19 : index
    %255 = vector.load %arg12[%c0_185, %c19_186] : memref<4x326xf32, #tpu.memory_space<vmem>>, vector<4x288xf32>
    tpu.vector_store %arg12[%c0_185, %c19_186], %254 {strides = array<i32>} : memref<4x326xf32, #tpu.memory_space<vmem>>, vector<4x288xf32>,
    %c0_187 = arith.constant 0 : index
    %c72 = arith.constant 72 : index
    %256 = vector.load %arg6[%c0_187, %c72] : memref<4x108xf32, #tpu.memory_space<vmem>>, vector<4x36xf32>
    %c0_188 = arith.constant 0 : index
    %c0_189 = arith.constant 0 : index
    %257 = vector.load %arg12[%c0_188, %c0_189] : memref<4x326xf32, #tpu.memory_space<vmem>>, vector<4x288xf32>
    %c0_190 = arith.constant 0 : index
    %c0_191 = arith.constant 0 : index
    %258 = vector.load %arg13[%c0_190, %c0_191] : memref<72x288xf32, #tpu.memory_space<vmem>>, vector<4x288xf32>
    tpu.vector_store %arg13[%c0_190, %c0_191], %257 {strides = array<i32>} : memref<72x288xf32, #tpu.memory_space<vmem>>, vector<4x288xf32>,
    %c0_192 = arith.constant 0 : index
    %c1_193 = arith.constant 1 : index
    %259 = vector.load %arg12[%c0_192, %c1_193] : memref<4x326xf32, #tpu.memory_space<vmem>>, vector<4x288xf32>
    %c4_194 = arith.constant 4 : index
    %c0_195 = arith.constant 0 : index
    %260 = vector.load %arg13[%c4_194, %c0_195] : memref<72x288xf32, #tpu.memory_space<vmem>>, vector<4x288xf32>
    tpu.vector_store %arg13[%c4_194, %c0_195], %259 {strides = array<i32>} : memref<72x288xf32, #tpu.memory_space<vmem>>, vector<4x288xf32>,
    %c0_196 = arith.constant 0 : index
    %c2_197 = arith.constant 2 : index
    %261 = vector.load %arg12[%c0_196, %c2_197] : memref<4x326xf32, #tpu.memory_space<vmem>>, vector<4x288xf32>
    %c8_198 = arith.constant 8 : index
    %c0_199 = arith.constant 0 : index
    %262 = vector.load %arg13[%c8_198, %c0_199] : memref<72x288xf32, #tpu.memory_space<vmem>>, vector<4x288xf32>
    tpu.vector_store %arg13[%c8_198, %c0_199], %261 {strides = array<i32>} : memref<72x288xf32, #tpu.memory_space<vmem>>, vector<4x288xf32>,
    %c0_200 = arith.constant 0 : index
    %c18_201 = arith.constant 18 : index
    %263 = vector.load %arg12[%c0_200, %c18_201] : memref<4x326xf32, #tpu.memory_space<vmem>>, vector<4x288xf32>
    %c12_202 = arith.constant 12 : index
    %c0_203 = arith.constant 0 : index
    %264 = vector.load %arg13[%c12_202, %c0_203] : memref<72x288xf32, #tpu.memory_space<vmem>>, vector<4x288xf32>
    tpu.vector_store %arg13[%c12_202, %c0_203], %263 {strides = array<i32>} : memref<72x288xf32, #tpu.memory_space<vmem>>, vector<4x288xf32>,
    %c0_204 = arith.constant 0 : index
    %c19_205 = arith.constant 19 : index
    %265 = vector.load %arg12[%c0_204, %c19_205] : memref<4x326xf32, #tpu.memory_space<vmem>>, vector<4x288xf32>
    %c16_206 = arith.constant 16 : index
    %c0_207 = arith.constant 0 : index
    %266 = vector.load %arg13[%c16_206, %c0_207] : memref<72x288xf32, #tpu.memory_space<vmem>>, vector<4x288xf32>
    tpu.vector_store %arg13[%c16_206, %c0_207], %265 {strides = array<i32>} : memref<72x288xf32, #tpu.memory_space<vmem>>, vector<4x288xf32>,
    %c0_208 = arith.constant 0 : index
    %c20_209 = arith.constant 20 : index
    %267 = vector.load %arg12[%c0_208, %c20_209] : memref<4x326xf32, #tpu.memory_space<vmem>>, vector<4x288xf32>
    %c20_210 = arith.constant 20 : index
    %c0_211 = arith.constant 0 : index
    %268 = vector.load %arg13[%c20_210, %c0_211] : memref<72x288xf32, #tpu.memory_space<vmem>>, vector<4x288xf32>
    tpu.vector_store %arg13[%c20_210, %c0_211], %267 {strides = array<i32>} : memref<72x288xf32, #tpu.memory_space<vmem>>, vector<4x288xf32>,
    %c0_212 = arith.constant 0 : index
    %c36_213 = arith.constant 36 : index
    %269 = vector.load %arg12[%c0_212, %c36_213] : memref<4x326xf32, #tpu.memory_space<vmem>>, vector<4x288xf32>
    %c24_214 = arith.constant 24 : index
    %c0_215 = arith.constant 0 : index
    %270 = vector.load %arg13[%c24_214, %c0_215] : memref<72x288xf32, #tpu.memory_space<vmem>>, vector<4x288xf32>
    tpu.vector_store %arg13[%c24_214, %c0_215], %269 {strides = array<i32>} : memref<72x288xf32, #tpu.memory_space<vmem>>, vector<4x288xf32>,
    %c0_216 = arith.constant 0 : index
    %c37_217 = arith.constant 37 : index
    %271 = vector.load %arg12[%c0_216, %c37_217] : memref<4x326xf32, #tpu.memory_space<vmem>>, vector<4x288xf32>
    %c28_218 = arith.constant 28 : index
    %c0_219 = arith.constant 0 : index
    %272 = vector.load %arg13[%c28_218, %c0_219] : memref<72x288xf32, #tpu.memory_space<vmem>>, vector<4x288xf32>
    tpu.vector_store %arg13[%c28_218, %c0_219], %271 {strides = array<i32>} : memref<72x288xf32, #tpu.memory_space<vmem>>, vector<4x288xf32>,
    %c0_220 = arith.constant 0 : index
    %c38_221 = arith.constant 38 : index
    %273 = vector.load %arg12[%c0_220, %c38_221] : memref<4x326xf32, #tpu.memory_space<vmem>>, vector<4x288xf32>
    %c32_222 = arith.constant 32 : index
    %c0_223 = arith.constant 0 : index
    %274 = vector.load %arg13[%c32_222, %c0_223] : memref<72x288xf32, #tpu.memory_space<vmem>>, vector<4x288xf32>
    tpu.vector_store %arg13[%c32_222, %c0_223], %273 {strides = array<i32>} : memref<72x288xf32, #tpu.memory_space<vmem>>, vector<4x288xf32>,
    %c0_224 = arith.constant 0 : index
    %c0_225 = arith.constant 0 : index
    %275 = vector.load %arg13[%c0_224, %c0_225] : memref<72x288xf32, #tpu.memory_space<vmem>>, vector<36x288xf32>
    %cst_226 = arith.constant dense<0.000000e+00> : vector<4x288xf32>
    %276 = tpu.matmul %256, %275, %cst_226 {dimension_numbers = #tpu.dot_dimension_numbers<[1], [0], [0], [1], [0, 0, 1, 1], [], []>} : vector<4x36xf32>, vector<36x288xf32>, vector<4x288xf32> -> vector<4x288xf32>
    %c0_227 = arith.constant 0 : index
    %c1_228 = arith.constant 1 : index
    %277 = vector.load %arg7[%c0_227, %c1_228] : memref<4x2xf32, #tpu.memory_space<vmem>>, vector<4x1xf32>
    %278 = vector.broadcast %277 : vector<4x1xf32> to vector<4x288xf32>
    %279 = arith.addf %276, %278 : vector<4x288xf32>
    %cst_229 = arith.constant 0.000000e+00 : f32
    %280 = vector.broadcast %cst_229 : f32 to vector<4x288xf32>
    %281 = arith.maximumf %279, %280 : vector<4x288xf32>
    %c0_230 = arith.constant 0 : index
    %c0_231 = arith.constant 0 : index
    %c0_232 = arith.constant 0 : index
    %282 = vector.load %arg9[%c0_230, %c0_231, %c0_232] : memref<1x4x288xf32, #tpu.memory_space<vmem>>, vector<1x4x288xf32>
    %283 = vector.shape_cast %282 : vector<1x4x288xf32> to vector<4x288xf32>
    %284 = vector.shape_cast %281 : vector<4x288xf32> to vector<1x4x288xf32>
    tpu.vector_store %arg9[%c0_230, %c0_231, %c0_232], %284 {strides = array<i32>} : memref<1x4x288xf32, #tpu.memory_space<vmem>>, vector<1x4x288xf32>,
    return
  }
  func.func @transform_0(%arg0: i32) -> (i32, i32, i32) {
    %c0_i32 = arith.constant 0 : i32
    %c0_i32_0 = arith.constant 0 : i32
    %c0_i32_1 = arith.constant 0 : i32
    return %arg0, %c0_i32, %c0_i32_0 : i32, i32, i32
  }
  func.func @transform_1(%arg0: i32) -> (i32, i32, i32) {
    %c0_i32 = arith.constant 0 : i32
    %c0_i32_0 = arith.constant 0 : i32
    %c0_i32_1 = arith.constant 0 : i32
    return %arg0, %c0_i32, %c0_i32_0 : i32, i32, i32
  }
  func.func @transform_2(%arg0: i32) -> (i32, i32) {
    %c0_i32 = arith.constant 0 : i32
    %c0_i32_0 = arith.constant 0 : i32
    %c0_i32_1 = arith.constant 0 : i32
    return %c0_i32, %c0_i32_0 : i32, i32
  }
  func.func @transform_3(%arg0: i32) -> (i32, i32) {
    %c0_i32 = arith.constant 0 : i32
    %c0_i32_0 = arith.constant 0 : i32
    %c0_i32_1 = arith.constant 0 : i32
    return %c0_i32, %c0_i32_0 : i32, i32
  }
  func.func @transform_4(%arg0: i32) -> (i32, i32) {
    %c0_i32 = arith.constant 0 : i32
    %c0_i32_0 = arith.constant 0 : i32
    %c0_i32_1 = arith.constant 0 : i32
    return %c0_i32, %c0_i32_0 : i32, i32
  }
  func.func @transform_5(%arg0: i32) -> (i32, i32) {
    %c0_i32 = arith.constant 0 : i32
    %c0_i32_0 = arith.constant 0 : i32
    %c0_i32_1 = arith.constant 0 : i32
    return %c0_i32, %c0_i32_0 : i32, i32
  }
  func.func @transform_6(%arg0: i32) -> (i32, i32) {
    %c0_i32 = arith.constant 0 : i32
    %c0_i32_0 = arith.constant 0 : i32
    %c0_i32_1 = arith.constant 0 : i32
    return %c0_i32, %c0_i32_0 : i32, i32
  }
  func.func @transform_7(%arg0: i32) -> (i32, i32) {
    %c0_i32 = arith.constant 0 : i32
    %c0_i32_0 = arith.constant 0 : i32
    %c0_i32_1 = arith.constant 0 : i32
    return %c0_i32, %c0_i32_0 : i32, i32
  }
  func.func @transform_8(%arg0: i32) -> (i32, i32, i32) {
    %c0_i32 = arith.constant 0 : i32
    %c0_i32_0 = arith.constant 0 : i32
    %c0_i32_1 = arith.constant 0 : i32
    return %arg0, %c0_i32, %c0_i32_0 : i32, i32, i32
  }
}

</mosaic_0001>

<bundles_post_ra>
// kernel: tpu_custom_call.1
= control target key start
LH: loop header
LB: loop body
LE: loop exit
PB: predicated region body
PF: predicated region fallthrough
CT: control target
= control target key end

     0   :  { %s3524_s0 = inlined_call_operand.hbm [shape: f32[2,8,324], index: 0, kind: input, shape index: {}]   ;;  %s3525_s1 = inlined_call_operand.hbm [shape: f32[2,4,288], index: 1, kind: input, shape index: {}]   ;;  %s3526_s2 = inlined_call_operand.hbm [shape: f32[1,34], index: 2, kind: input, shape index: {}]   ;;  %s3527_s3 = inlined_call_operand.vmem [shape: f32[4,9], index: 3, kind: input, shape index: {}]   ;;  %s3528_s4 = inlined_call_operand.hbm [shape: f32[134,288], index: 4, kind: input, shape index: {}]   ;;  %s3529_s5 = inlined_call_operand.vmem [shape: f32[4,108], index: 5, kind: input, shape index: {}]   ;;  %s3530_s6 = inlined_call_operand.vmem [shape: f32[4,2], index: 6, kind: input, shape index: {}]   ;;  %s3531_s7 = inlined_call_operand.vmem [shape: f32[1,288], index: 7, kind: input, shape index: {}]   ;;  %s3532_s8 = inlined_call_operand.hbm [shape: f32[2,4,288], index: 8, kind: output, shape index: {}]  }
   0x1   :  { %3539 = sst [smem:[#allocation21_spill]] %s3524_s0 }
   0x2   :  { %3540 = sst [smem:[#allocation22_spill]] %s3526_s2 }
   0x3   :  { %3541 = sst [smem:[#allocation23_spill]] %s3528_s4 }
   0x4   :  { %13 = vsyncpa [#allocation7], 0 }
   0x5   :  { %15 = vsyncpa [#allocation7 + $0x1], 0 }
   0x6   :  { %16 = vsyncpa [#allocation10], 0 }
   0x7   :  { %18 = vsyncpa [#allocation10 + $0x1], 0 }
   0x8   :  { %19 = vsyncpa [#allocation13], 0 }
   0x9   :  { %20 = vsyncpa [#allocation8], 0 }
   0xa   :  { %22 = vsyncpa [#allocation8 + $0x1], 0  ;;  %s2865_s27 = smov 0   ;;  %s2867_s28 = smov 0  }
   0xb   :  { %s2869_s29 = smov 0   ;;  %s2871_s30 = smov 0  }
   0xc LB: > { %s2886_s9 = sadd.s32 4294967295, %s2747_s30   ;;  %s2186_s10 = sadd.s32 4294967294, %s2747_s30   ;;  %s2747_s30 = sphi %s2871_s30, %s3569_s30   ;;  %s2743_s29 = sphi %s2869_s29, %s3568_s29   ;;  %s2739_s28 = sphi %s2867_s28, %s3567_s28   ;;  %s2735_s27 = sphi %s2865_s27, %s3566_s27  }
   0xd   : > { %p48_p0 = scmp.ne.s32.totalorder %s2739_s28, %s2735_s27  ;;  %p3533_p1 = scmp.eq.s32.totalorder %s2886_s9, 0 }
   0xe   : > { %p230_p3 = scmp.eq.s32.totalorder %s2186_s10, 1  ;;  %p2187_p5 = scmp.ge.s32.totalorder %s2747_s30, 1 }
   0xf   : > { %p2895_p4 = por %p3533_p1, %p48_p0  ;;  %p237_p7 = scmp.lt.s32.totalorder %s2747_s30, 3 }
  0x10   : > { %p2900_p6 = por %p230_p3, %p48_p0  ;;  %s2749_s14 = smov [#allocation11]  }
  0x11   : > { %s3542_s11 = scalar_select %p2895_p4, 1, 0 }
  0x12   : > { %s3543_s12 = scalar_select %p2900_p6, 1, 0 }
  0x13   : > { %p2905_p8 = pnand %p2187_p5, %p237_p7  ;;  %s250_s15 = sshll.u32 %s2749_s14, 4  ;;  %s251_s15 = int_to_ptr.vmem [resolvable:$true] %s250_s15 }
  0x14   : > { %s2750_s16 = smov [#allocation12]   ;;  %s3546_s2 = sld [smem:[#allocation22_spill]] }
  0x15   : > { %s3544_s13 = scalar_select %p2905_p8, 1, 0 }
  0x16   : > { %p2385_p10 = pneg %p2905_p8  ;;  %s263_s17 = sshll.u32 %s2750_s16, 4  ;;  %s2918_s17 = int_to_ptr.vmem [resolvable:$true] %s263_s17 }
  0x18   : > { %p2914_p11 = pnand %p2385_p10, %p3533_p1 }
  0x1a   : > { %s2553_s21 = scalar_lea.hbm %s3546_s2, 16  ;;  %p2555_p13 = pneg %p2914_p11 }
  0x1b   : > { %p2554_p12 = scmp.ne.s32.totalorder %s3546_s2, %s2553_s21  ;;  %p2560_p5 = scmp.lt.u32.totalorder %s2553_s21, %s3546_s2 }
  0x1d   : > { %p2556_p0 = pnand %p2555_p13, %p2554_p12 }
  0x1f   : > { %p2557_p3 = pneg %p2556_p0 }
  0x21   : > { %p2562_p7 = pnand %p2560_p5, %p2557_p3 }
  0x23   : > { %2565 = shalt.err (!%p2562_p7)
}
  0x24   : > { %s2566_s26 = scalar_lea.vmem %s251_s15, 16  ;;  %s2573_s10 = scalar_lea.vmem %s251_s15, 32 }
  0x25   : > { %p2567_p10 = scmp.ne.s32.totalorder %s251_s15, %s2566_s26  ;;  %p2574_p2 = scmp.lt.s32.totalorder %s251_s15, %s251_s15 }
  0x26   : > { %p2575_p6 = scmp.lt.s32.totalorder %s2573_s10, %s2566_s26 }
  0x27   : > { %p2569_p9 = pnand %p2567_p10, %p2555_p13 }
  0x28   : > { %p2576_p4 = por %p2575_p6, %p2574_p2 }
  0x29   : > { %p2570_p1 = pneg %p2569_p9 }
  0x2b   : > { %p2577_p8 = pnand %p2576_p4, %p2570_p1 }
  0x2d   : > { %2580 = shalt.err (!%p2577_p8)
}
  0x2e   : > { %2388 = dma.hbm_to_vmem [thread:$0]  (!%p2914_p11), %s3546_s2, 16, %s251_s15, [#allocation10]  }
  0x2f   : > { %s3547_s4 = sld [smem:[#allocation23_spill]] }
  0x35   : > { %s2581_s21 = scalar_lea.hbm %s3547_s4, 6528 }
  0x36   : > { %p2582_p9 = scmp.ne.s32.totalorder %s3547_s4, %s2581_s21  ;;  %p2588_p4 = scmp.lt.u32.totalorder %s2581_s21, %s3547_s4 }
  0x38   : > { %p2584_p2 = pnand %p2582_p9, %p2555_p13 }
  0x3a   : > { %p2585_p1 = pneg %p2584_p2 }
  0x3c   : > { %p2590_p6 = pnand %p2588_p4, %p2585_p1 }
  0x3e   : > { %2593 = shalt.err (!%p2590_p6)
}
  0x3f   : > { %s2594_s15 = scalar_lea.vmem %s2918_s17, 6528  ;;  %p2602_p3 = scmp.lt.s32.totalorder %s2918_s17, %s2918_s17 }
  0x40   : > { %p2595_p8 = scmp.ne.s32.totalorder %s2918_s17, %s2594_s15  ;;  %p2603_p5 = scmp.lt.s32.totalorder %s2594_s15, %s2594_s15 }
  0x42   : > { %p2597_p12 = pnand %p2595_p8, %p2555_p13  ;;  %p2604_p7 = por %p2603_p5, %p2602_p3 }
  0x44   : > { %p2598_p0 = pneg %p2597_p12 }
  0x46   : > { %p2605_p10 = pnand %p2604_p7, %p2598_p0 }
  0x48   : > { %2608 = shalt.err (!%p2605_p10)
}
  0x49   : > { %s2751_s26 = smov 384   ;;  %s2752_s10 = smov 24  }
  0x4a   : > { %2391 = dma.hbm_to_vmem [thread:$0]  (!%p2914_p11), %s3547_s4, 6528, %s2918_s17, [#allocation13], %s2751_s26, %s2751_s26, %s2752_s10  }
  0x4b   : > { %s2968_s19 = sadd.s32 1, %s2747_s30   ;;  %s35_s20 = sadd.s32 1, %s2743_s29 }
  0x4c   : > { %s32_s21 = ssub.s32 %s2747_s30, %s2968_s19  ;;  %p42_p13 = scmp.ne.s32.totalorder %s2743_s29, %s2739_s28 }
  0x4d   : > { %p33_p9 = scmp.eq.s32.totalorder %s32_s21, 0  ;;  %p43_p2 = scmp.eq.s32.totalorder %s2747_s30, 0 }
  0x4e   : > { %p3548_p1 = scmp.eq.s32.totalorder %s2886_s9, 1  ;;  %p2405_p6 = scmp.lt.s32.totalorder %s2747_s30, 2 }
  0x4f   : > { %s2984_s18 = scalar_select %p33_p9, %s2743_s29, %s35_s20  }
  0x50   : > { %p2978_p4 = por %p3548_p1, %p42_p13  ;;  %p44_p8 = por %p43_p2, %p42_p13 }
  0x51   : > { %3550 = sst [smem:[#allocation20_spill]] %s2984_s18  ;;  %s2987_s23 = sand.u32 1, %s2743_s29  }
  0x52   : > { %s3549_s22 = scalar_select %p2978_p4, 1, 0 }
  0x53   : > { %s2364_s17 = smul.u32 24, %s2987_s23  ;;  %p2991_p11 = pnand %p2405_p6, %p44_p8 }
  0x54   : > { %s2365_s24 = smul.u32 384, %s2747_s30  ;;  %s3552_s0 = sld [smem:[#allocation21_spill]] }
  0x55   : > { %s290_s16 = scalar_lea.vmem [#allocation6], %s2364_s17  ;;  %s287_s21 = scalar_lea.sflag [#allocation7], %s2987_s23 }
  0x56   : > { %s298_s20 = sshll.u32 %s290_s16, 4  ;;  %p2611_p0 = pneg %p2991_p11  ;;  %s3001_s20 = int_to_ptr.vmem [resolvable:$true] %s298_s20 }
  0x5a   : > { %s2999_s14 = scalar_lea.hbm %s3552_s0, %s2365_s24  ;;  %s2614_s10 = scalar_lea.hbm %s3552_s0, 768 }
  0x5b   : > { %s2609_s2 = scalar_lea.hbm %s2999_s14, 384  ;;  %p2615_p7 = scmp.lt.u32.totalorder %s2999_s14, %s3552_s0 }
  0x5c   : > { %p2610_p12 = scmp.ne.s32.totalorder %s2999_s14, %s2609_s2  ;;  %p2616_p10 = scmp.lt.u32.totalorder %s2614_s10, %s2609_s2 }
  0x5d   : > { %p2618_p9 = scmp.lt.u32.totalorder %s2609_s2, %s2999_s14 }
  0x5e   : > { %p2612_p3 = pnand %p2611_p0, %p2610_p12  ;;  %p2617_p13 = por %p2616_p10, %p2615_p7 }
  0x60   : > { %p2613_p5 = pneg %p2612_p3  ;;  %p2619_p2 = por %p2618_p9, %p2617_p13 }
  0x62   : > { %p2620_p1 = pnand %p2619_p2, %p2613_p5 }
  0x64   : > { %2623 = shalt.err (!%p2620_p1)
}
  0x65   : > { %s2624_s17 = scalar_lea.vmem %s3001_s20, 384  ;;  %s2753_s16 = smov [#allocation6]  }
  0x66   : > { %p2625_p6 = scmp.ne.s32.totalorder %s3001_s20, %s2624_s17  ;;  %s2629_s26 = sshll.u32 %s2753_s16, 4  ;;  %s2630_s26 = int_to_ptr.vmem [resolvable:$false] %s2629_s26 }
  0x67   : > { %s2631_s4 = scalar_lea.vmem %s2630_s26, 768  ;;  %p2632_p3 = scmp.lt.s32.totalorder %s3001_s20, %s2630_s26 }
  0x68   : > { %p2627_p8 = pnand %p2625_p6, %p2611_p0  ;;  %p2633_p7 = scmp.lt.s32.totalorder %s2631_s4, %s2624_s17 }
  0x6a   : > { %p2628_p12 = pneg %p2627_p8  ;;  %p2634_p10 = por %p2633_p7, %p2632_p3 }
  0x6c   : > { %p2635_p13 = pnand %p2634_p10, %p2628_p12 }
  0x6e   : > { %2638 = shalt.err (!%p2635_p13)
}
  0x6f   : > { %2395 = dma.hbm_to_vmem [thread:$0]  (!%p2991_p11), %s2999_s14, 384, %s3001_s20, %s287_s21  }
  0x70   : > { %s2366_s2 = smul.u32 12, %s2987_s23  ;;  %s3553_s4 = sand.u32 1, %s2747_s30  }
  0x71   : > { %s2367_s15 = smul.u32 192, %s2747_s30  ;;  %s306_s0 = scalar_lea.sflag [#allocation10], %s3553_s4 }
  0x72   : > { %s309_s17 = scalar_lea.vmem [#allocation9], %s2366_s2  ;;  %s2644_s20 = scalar_lea.hbm %s3525_s1, 384 }
  0x73   : > { %s3034_s16 = scalar_lea.hbm %s3525_s1, %s2367_s15  ;;  %s317_s26 = sshll.u32 %s309_s17, 4  ;;  %s318_s26 = int_to_ptr.vmem [resolvable:$true] %s317_s26 }
  0x74   : > { %s2639_s18 = scalar_lea.hbm %s3034_s16, 192  ;;  %p2645_p1 = scmp.lt.u32.totalorder %s3034_s16, %s3525_s1 }
  0x75   : > { %p2640_p5 = scmp.ne.s32.totalorder %s3034_s16, %s2639_s18  ;;  %p2646_p6 = scmp.lt.u32.totalorder %s2644_s20, %s2639_s18 }
  0x76   : > { %p2648_p12 = scmp.lt.u32.totalorder %s2639_s18, %s3034_s16 }
  0x77   : > { %p2642_p9 = pnand %p2640_p5, %p2611_p0  ;;  %p2647_p8 = por %p2646_p6, %p2645_p1 }
  0x79   : > { %p2643_p2 = pneg %p2642_p9  ;;  %p2649_p3 = por %p2648_p12, %p2647_p8 }
  0x7b   : > { %p2650_p7 = pnand %p2649_p3, %p2643_p2 }
  0x7d   : > { %2653 = shalt.err (!%p2650_p7)
}
  0x7e   : > { %s2654_s2 = scalar_lea.vmem %s318_s26, 192  ;;  %s2754_s24 = smov [#allocation9]  }
  0x7f   : > { %p2655_p10 = scmp.ne.s32.totalorder %s318_s26, %s2654_s2  ;;  %s2659_s10 = sshll.u32 %s2754_s24, 4  ;;  %s2660_s10 = int_to_ptr.vmem [resolvable:$false] %s2659_s10 }
  0x80   : > { %s2661_s17 = scalar_lea.vmem %s2660_s10, 384  ;;  %p2662_p9 = scmp.lt.s32.totalorder %s318_s26, %s2660_s10 }
  0x81   : > { %p2657_p13 = pnand %p2655_p10, %p2611_p0  ;;  %p2663_p4 = scmp.lt.s32.totalorder %s2661_s17, %s2654_s2 }
  0x83   : > { %p2658_p5 = pneg %p2657_p13  ;;  %p2664_p1 = por %p2663_p4, %p2662_p9 }
  0x85   : > { %p2665_p6 = pnand %p2664_p1, %p2658_p5 }
  0x87   : > { %2668 = shalt.err (!%p2665_p6)
}
  0x88   : > { %2398 = dma.hbm_to_vmem [thread:$0]  (!%p2991_p11), %s3034_s16, 192, %s318_s26, %s306_s0  }
  0x89   : > { %p3554_p2 = scmp.ne.s32.totalorder %s3544_s13, 0 }
  0x8a   : > { %s3060_s18 = sand.u32 (!%p3554_p2), 1, %s2739_s28   ;;  %p3555_p4 = scmp.ne.s32.totalorder (!%p3554_p2), %s3542_s11, 0 }
  0x8b   : > { %326 = sbr.rel (%p3554_p2) target bundleno = 2099 (0x833), region = 52  ;;  %s329_s23 = scalar_lea.sflag (!%p3554_p2), [#allocation7], %s3060_s18 }
  0x8c   : > { %s2368_s4 = smul.u32 (!%p3554_p2), 24, %s3060_s18 }
  0x8e   : > { %s3064_s14 = scalar_lea.vmem (!%p3554_p2), [#allocation6], %s2368_s4 }
  0x92   : > { %2714 = dma.done.wait (%p3555_p4), %s329_s23, 384  }
  0x93   : > { %2716 = vsyncadd (%p3555_p4), %s329_s23, 4294966912  ;;  %s337_s0 = sand.u32 1, %s2886_s9   ;;  %s3537_s13 = smul.u32 12, %s3060_s18 }
  0x94   : > { %s338_s25 = scalar_lea.sflag [#allocation10], %s337_s0 }
  0x95   : > { %s3074_s16 = scalar_lea.vmem [#allocation9], %s3537_s13 }
  0x96   : > { %2718 = dma.done.wait (%p3555_p4), %s338_s25, 192  }
  0x97   : > { %2720 = vsyncadd (%p3555_p4), %s338_s25, 4294967104  ;;  %p3556_p11 = scmp.eq.s32.totalorder %s2886_s9, 0 }
  0x99   : > { %2722 = dma.done.wait (%p3556_p11), [#allocation10], 16   ;;  %p3557_p0 = pmov %p3556_p11 }
  0x9b   : > { %2724 = vsyncadd (%p3557_p0), [#allocation10], 4294967280  ;;  %p3558_p8 = pmov %p3557_p0 }
  0x9c   : > { %p3559_p12 = pmov %p3557_p0 }
  0x9d   : > { %2726 = dma.done.wait (%p3558_p8), [#allocation13], 6528  }
  0x9e   : > { %2728 = vsyncadd (%p3559_p12), [#allocation13], 4294960768  ;;  %v2755_v0 = vmov 11   ;;  %v2756_v1 = vmov 10   ;;  %v3088_v2 = vld [vmem:[#allocation11] sm:$0x1]  ;;  %v418_v37 = vlaneseq }
  0x9f   : > { %2511 = vset.pattern.permute.xlu1 %v2755_v0  ;;  %2509 = vset.pattern.permute.xlu0 %v2756_v1  ;;  %v3092_v3 = vld [vmem:[#allocation11] sm:$0x1]  ;;  %v2757_v4 = vmov 22   ;;  %v2758_v5 = vmov 21   ;;  %v2759_v7 = vmov 1   ;;  %v2760_v8 = vmov 12  }
  0xa0   : > { %613 = vperm.xlu1 %2511, %v3088_v2   ;;  %597 = vperm.xlu0 %2509, %v3088_v2   ;;  %v3096_v6 = vld [vmem:[#allocation11] sm:$0x1]  ;;  %v2761_v9 = vmov 23   ;;  %v2762_v10 = vmov 13   ;;  %v2763_v11 = vmov 2   ;;  %v2764_v12 = vmov 14  }
  0xa1   : > { %v2765_v13 = vmov 24   ;;  %v2766_v14 = vmov 15   ;;  %v2767_v15 = vmov 3   ;;  %v2768_v16 = vmov 16   ;;  %s2789_s11 = smov 127   ;;  %s2790_s26 = smov 126  }
  0xa2   : > { %v2769_v17 = vmov 25   ;;  %v2770_v18 = vmov 17   ;;  %v2771_v19 = vmov 4   ;;  %v2772_v20 = vmov 18   ;;  %s2791_s20 = smov 110   ;;  %s2792_s21 = smov 92  }
  0xa3   : > { %v2773_v21 = vmov 26   ;;  %v2774_v22 = vmov 19   ;;  %v2775_v23 = vmov 5   ;;  %v2776_v24 = vmov 20   ;;  %s2793_s15 = smov 125   ;;  %s2794_s2 = smov 74  }
  0xa4   : > { %2512 = vset.pattern.permute.xlu1 %v2757_v4  ;;  %2510 = vset.pattern.permute.xlu0 %v2758_v5  ;;  %v2777_v25 = vmov 27   ;;  %v2778_v26 = vmov 0   ;;  %v2779_v27 = vmov 6   ;;  %v2780_v28 = vmov 28   ;;  %s2795_s24 = smov 124   ;;  %s3538_s10 = smov 56  }
  0xa5   : > { %814 = vperm.xlu1 %2512, %v3092_v3   ;;  %798 = vperm.xlu0 %2510, %v3092_v3   ;;  %v2781_v29 = vmov 7   ;;  %v2782_v30 = vmov 29   ;;  %v2783_v31 = vmov 8   ;;  %v2784_v32 = vmov 30   ;;  %s2797_s17 = smov 123   ;;  %s2798_s4 = smov 38  }
  0xa6   : > { %v2785_v33 = vmov 9   ;;  %v2786_v34 = vmov 31   ;;  %v2787_v35 = vmov 32   ;;  %v2788_v36 = vmov 33   ;;  %s2799_s23 = smov 122   ;;  %s2800_s0 = smov 109  }
  0xa7   : > { %v3130_v38 = vshrl.u32 %v418_v37, 7  ;;  %v3136_v40 = vld [vmem:[%s3064_s14 + $0x6] ss:$8 sm:$0x3]  ;;  %s2801_s25 = smov 20   ;;  %s2812_s13 = smov 76  }
  0xa8   : > { %v3142_v46 = vld [vmem:[%s3064_s14 + $0x7] ss:$8 sm:$0x3]  ;;  %v3152_v53 = vld [vmem:[%s3064_s14 + $0x5] ss:$8 sm:$0x3] }
  0xa9   : > { %2513 = vset.pattern.permute.xlu1 %v2759_v7  ;;  %2514 = vset.pattern.permute.xlu0 %v2760_v8  ;;  %v3133_v39 = vsub.s32 0, %v3130_v38  ;;  %vm436_vm0 = vcmask 1039360   ;;  %vm470_vm1 = vcmask 900096   ;;  %vm453_vm2 = vcmask 1031168   ;;  %p3562_p7 = scmp.ne.s32.totalorder %s3549_s22, 0 }
  0xaa   : > { %424 = vperm.xlu1 %2513, %v3096_v6   ;;  %629 = vperm.xlu0 %2514, %v3088_v2   ;;  %vm521_vm3 = vcmask 752640   ;;  %vm641_vm4 = vcmask 1022976   ;;  %vm842_vm5 = vcmask 605184   ;;  %vm658_vm6 = vcmask 1014784  }
  0xab   : > { %vm859_vm7 = vcmask 457728   ;;  %vm675_vm8 = vcmask 1006592   ;;  %vm692_vm9 = vcmask 998400   ;;  %vm487_vm10 = vcmask 891904  }
  0xac   : > { %vm709_vm11 = vcmask 990208   ;;  %vm778_vm12 = vcmask 310272   ;;  %vm504_vm13 = vcmask 883712   ;;  %vm892_vm14 = vcmask 162816  }
  0xad   : > { %vm726_vm15 = vcmask 982016  }
  0xae   : > { %2515 = vset.pattern.permute.xlu1 %v2761_v9  ;;  %2517 = vset.pattern.permute.xlu0 %v2762_v10 }
  0xaf   : > { %830 = vperm.xlu1 %2515, %v3092_v3   ;;  %646 = vperm.xlu0 %2517, %v3088_v2  }
  0xb3   : > { %2516 = vset.pattern.permute.xlu1 %v2763_v11  ;;  %2520 = vset.pattern.permute.xlu0 %v2764_v12 }
  0xb4   : > { %441 = vperm.xlu1 %2516, %v3096_v6   ;;  %663 = vperm.xlu0 %2520, %v3088_v2  }
  0xb8   : > { %2518 = vset.pattern.permute.xlu1 %v2765_v13  ;;  %2523 = vset.pattern.permute.xlu0 %v2766_v14 }
  0xb9   : > { %847 = vperm.xlu1 %2518, %v3092_v3   ;;  %680 = vperm.xlu0 %2523, %v3088_v2  }
  0xbd   : > { %2519 = vset.pattern.permute.xlu1 %v2767_v15  ;;  %2526 = vset.pattern.permute.xlu0 %v2768_v16 }
  0xbe   : > { %458 = vperm.xlu1 %2519, %v3096_v6   ;;  %697 = vperm.xlu0 %2526, %v3088_v2  }
  0xc2   : > { %2521 = vset.pattern.permute.xlu1 %v2769_v17  ;;  %2529 = vset.pattern.permute.xlu0 %v2770_v18 }
  0xc3   : > { %864 = vperm.xlu1 %2521, %v3092_v3   ;;  %714 = vperm.xlu0 %2529, %v3088_v2  }
  0xc7   : > { %2522 = vset.pattern.permute.xlu1 %v2771_v19  ;;  %2532 = vset.pattern.permute.xlu0 %v2772_v20 }
  0xc8   : > { %475 = vperm.xlu1 %2522, %v3096_v6   ;;  %731 = vperm.xlu0 %2532, %v3088_v2  }
  0xcc   : > { %2524 = vset.pattern.permute.xlu1 %v2773_v21  ;;  %2535 = vset.pattern.permute.xlu0 %v2774_v22 }
  0xcd   : > { %880 = vperm.xlu1 %2524, %v3092_v3   ;;  %748 = vperm.xlu0 %2535, %v3088_v2  }
  0xd1   : > { %2525 = vset.pattern.permute.xlu1 %v2775_v23  ;;  %2538 = vset.pattern.permute.xlu0 %v2776_v24 }
  0xd2   : > { %492 = vperm.xlu1 %2525, %v3096_v6   ;;  %789 = vperm.xlu0 %2538, %v3092_v3  }
  0xd6   : > { %2527 = vset.pattern.permute.xlu1 %v2777_v25  ;;  %2544 = vset.pattern.permute.xlu0 %v2778_v26 }
  0xd7   : > { %899 = vperm.xlu1 %2527, %v3092_v3  }
  0xdb   : > { %2528 = vset.pattern.permute.xlu1 %v2779_v27 }
  0xdc   : > { %509 = vperm.xlu1 %2528, %v3096_v6  }
  0xe0   : > { %2530 = vset.pattern.permute.xlu1 %v2780_v28 }
  0xe1   : > { %916 = vperm.xlu1 %2530, %v3092_v3  }
  0xe5   : > { %2531 = vset.pattern.permute.xlu1 %v2781_v29 }
  0xe6   : > { %526 = vperm.xlu1 %2531, %v3096_v6  }
  0xea   : > { %2533 = vset.pattern.permute.xlu1 %v2782_v30 }
  0xeb   : > { %933 = vperm.xlu1 %2533, %v3092_v3  }
  0xef   : > { %2534 = vset.pattern.permute.xlu1 %v2783_v31 }
  0xf0   : > { %543 = vperm.xlu1 %2534, %v3096_v6  }
  0xf4   : > { %2536 = vset.pattern.permute.xlu1 %v2784_v32 }
  0xf5   : > { %950 = vperm.xlu1 %2536, %v3092_v3  }
  0xf9   : > { %2537 = vset.pattern.permute.xlu1 %v2785_v33 }
  0xfa   : > { %588 = vperm.xlu1 %2537, %v3088_v2  }
  0xfe   : > { %2539 = vset.pattern.permute.xlu1 %v2778_v26 }
  0xff   : > { %415 = vperm.xlu1 %2539, %v3096_v6  }
 0x103   : > { %2540 = vset.pattern.permute.xlu1 %v2786_v34 }
 0x104   : > { %560 = vperm.xlu1 %2540, %v3096_v6  }
 0x108   : > { %2541 = vset.pattern.permute.xlu1 %v2787_v35 }
 0x109   : > { %765 = vperm.xlu1 %2541, %v3088_v2  }
 0x10d   : > { %2542 = vset.pattern.permute.xlu1 %v2788_v36  ;;  %v2199_v36 = vld [vmem:[%s3064_s14 + $0xf] ss:$8 sm:$0x3] }
 0x10e   : > { %967 = vperm.xlu1 %2542, %v3092_v3  }
 0x112   : > { %2543 = vset.pattern.permute.xlu1 %v2783_v31 }
 0x11f   : > { %v614_v41 = vpop.permute.xlu1 %613  ;;  %v598_v42 = vpop.permute.xlu0 %597 }
 0x120   : > { %v603_v43 = vrot.slane %v598_v42, %v3133_v39  ;;  %v619_v44 = vrot.slane %v614_v41, %v3133_v39 }
 0x122   : > { %v604_v45 = vmul.f32 %v3136_v40, %v603_v43  ;;  %v620_v50 = vmul.f32 %v3136_v40, %v619_v44 }
 0x124   : > { %v815_v47 = vpop.permute.xlu1 %814  ;;  %v799_v48 = vpop.permute.xlu0 %798  ;;  %606 = vrot.lane.b32.xlu1 %v604_v45, %s2789_s11 }
 0x125   : > { %v804_v49 = vrot.slane %v799_v48, %v3133_v39  ;;  %v820_v51 = vrot.slane %v815_v47, %v3133_v39 }
 0x127   : > { %v805_v52 = vmul.f32 %v3142_v46, %v804_v49  ;;  %v821_v58 = vmul.f32 %v3142_v46, %v820_v51 }
 0x128   : > { %622 = vrot.lane.b32.xlu1 %v620_v50, %s2790_s26 }
 0x129   : > { %807 = vrot.lane.b32.xlu0 %v805_v52, %s2791_s20  ;;  %v425_v54 = vpop.permute.xlu1 %424  ;;  %v630_v55 = vpop.permute.xlu0 %629 }
 0x12a   : > { %v430_v56 = vrot.slane %v425_v54, %v3133_v39  ;;  %v635_v57 = vrot.slane %v630_v55, %v3133_v39 }
 0x12c   : > { %v431_v59 = vmul.f32 %v3152_v53, %v430_v56  ;;  %v636_v60 = vmul.f32 %v3136_v40, %v635_v57 }
 0x12d   : > { %823 = vrot.lane.b32.xlu0 %v821_v58, %s2792_s21 }
 0x12e   : > { %433 = vrot.lane.b32.xlu1 %v431_v59, %s2789_s11  ;;  %v831_v61 = vpop.permute.xlu1 %830  ;;  %v647_v62 = vpop.permute.xlu0 %646 }
 0x12f   : > { %v836_v63 = vrot.slane %v831_v61, %v3133_v39  ;;  %v652_v0 = vrot.slane %v647_v62, %v3133_v39 }
 0x131   : > { %v837_v1 = vmul.f32 %v3142_v46, %v836_v63  ;;  %638 = vrot.lane.b32.xlu0 %v636_v60, %s2793_s15  ;;  %v653_v2 = vmul.f32 %v3136_v40, %v652_v0  ;;  %s2802_s15 = smov 121  }
 0x133   : > { %839 = vrot.lane.b32.xlu1 %v837_v1, %s2794_s2  ;;  %v442_v3 = vpop.permute.xlu1 %441  ;;  %v664_v6 = vpop.permute.xlu0 %663  ;;  %s2803_s2 = smov 108  }
 0x134   : > { %v447_v4 = vrot.slane %v442_v3, %v3133_v39  ;;  %v669_v10 = vrot.slane %v664_v6, %v3133_v39 }
 0x136   : > { %v448_v5 = vmul.f32 %v3152_v53, %v447_v4  ;;  %v670_v12 = vmul.f32 %v3136_v40, %v669_v10 }
 0x137   : > { %655 = vrot.lane.b32.xlu1 %v653_v2, %s2795_s24  ;;  %s2804_s24 = smov 2  }
 0x138   : > { %450 = vrot.lane.b32.xlu0 %v448_v5, %s2790_s26  ;;  %v848_v8 = vpop.permute.xlu1 %847  ;;  %v681_v16 = vpop.permute.xlu0 %680 }
 0x139   : > { %v853_v9 = vrot.slane %v848_v8, %v3133_v39  ;;  %v686_v19 = vrot.slane %v681_v16, %v3133_v39 }
 0x13b   : > { %v854_v11 = vmul.f32 %v3142_v46, %v853_v9  ;;  %v687_v21 = vmul.f32 %v3136_v40, %v686_v19 }
 0x13d   : > { %856 = vrot.lane.b32.xlu0 %v854_v11, %s3538_s10  ;;  %v459_v13 = vpop.permute.xlu1 %458  ;;  %v698_v25 = vpop.permute.xlu0 %697 }
 0x13e   : > { %v464_v14 = vrot.slane %v459_v13, %v3133_v39  ;;  %v703_v28 = vrot.slane %v698_v25, %v3133_v39 }
 0x140   : > { %v465_v15 = vmul.f32 %v3152_v53, %v464_v14  ;;  %v704_v31 = vmul.f32 %v3136_v40, %v703_v28 }
 0x141   : > { %672 = vrot.lane.b32.xlu0 %v670_v12, %s2797_s17 }
 0x142   : > { %467 = vrot.lane.b32.xlu1 %v465_v15, %s2791_s20  ;;  %v865_v17 = vpop.permute.xlu1 %864  ;;  %v715_v29 = vpop.permute.xlu0 %714 }
 0x143   : > { %v870_v18 = vrot.slane %v865_v17, %v3133_v39  ;;  %v720_v49 = vrot.slane %v715_v29, %v3133_v39 }
 0x145   : > { %v871_v20 = vmul.f32 %v3142_v46, %v870_v18  ;;  %v721_v51 = vmul.f32 %v3136_v40, %v720_v49 }
 0x147   : > { %873 = vrot.lane.b32.xlu1 %v871_v20, %s2798_s4  ;;  %v476_v22 = vpop.permute.xlu1 %475  ;;  %v732_v35 = vpop.permute.xlu0 %731 }
 0x148   : > { %v481_v23 = vrot.slane %v476_v22, %v3133_v39  ;;  %v737_v43 = vrot.slane %v732_v35, %v3133_v39 }
 0x14a   : > { %v482_v24 = vmul.f32 %v3152_v53, %v481_v23  ;;  %v738_v47 = vmul.f32 %v3136_v40, %v737_v43 }
 0x14b   : > { %689 = vrot.lane.b32.xlu1 %v687_v21, %s2799_s23  ;;  %s2805_s23 = smov 119  }
 0x14c   : > { %484 = vrot.lane.b32.xlu0 %v482_v24, %s2800_s0  ;;  %v881_v26 = vpop.permute.xlu1 %880  ;;  %v749_v58 = vpop.permute.xlu0 %748 }
 0x14d   : > { %v886_v27 = vrot.slane %v881_v26, %v3133_v39  ;;  %v754_v62 = vrot.slane %v749_v58, %v3133_v39 }
 0x14f   : > { %v887_v30 = vmul.f32 %v3142_v46, %v886_v27  ;;  %v755_v1 = vmul.f32 %v3136_v40, %v754_v62 }
 0x151   : > { %889 = vrot.lane.b32.xlu0 %v887_v30, %s2801_s25  ;;  %v493_v32 = vpop.permute.xlu1 %492  ;;  %s2806_s25 = smov 120   ;;  %v790_v11 = vpop.permute.xlu0 %789 }
 0x152   : > { %v498_v33 = vrot.slane %v493_v32, %v3133_v39 }
 0x154   : > { %v499_v34 = vmul.f32 %v3152_v53, %v498_v33 }
 0x155   : > { %706 = vrot.lane.b32.xlu0 %v704_v31, %s2802_s15  ;;  %s2807_s15 = smov 112   ;;  %v795_v31 = vrot.slane %v790_v11, %v3133_v39 }
 0x156   : > { %501 = vrot.lane.b32.xlu1 %v499_v34, %s2803_s2  ;;  %v900_v41 = vpop.permute.xlu1 %899 }
 0x157   : > { %v905_v42 = vrot.slane %v900_v41, %v3133_v39 }
 0x159   : > { %v906_v44 = vmul.f32 %v2199_v36, %v905_v42  ;;  %v796_v42 = vmul.f32 %v3142_v46, %v795_v31 }
 0x15b   : > { %908 = vrot.lane.b32.xlu1 %v906_v44, %s2804_s24  ;;  %v510_v45 = vpop.permute.xlu1 %509  ;;  %s2808_s24 = smov 91  }
 0x15c   : > { %v515_v48 = vrot.slane %v510_v45, %v3133_v39 }
 0x15e   : > { %v516_v50 = vmul.f32 %v3152_v53, %v515_v48 }
 0x15f   : > { %740 = vrot.lane.b32.xlu1 %v738_v47, %s2805_s23  ;;  %s2809_s23 = smov 94  }
 0x160   : > { %518 = vrot.lane.b32.xlu0 %v516_v50, %s2792_s21  ;;  %v917_v52 = vpop.permute.xlu1 %916 }
 0x161   : > { %v922_v54 = vrot.slane %v917_v52, %v3133_v39 }
 0x163   : > { %v923_v56 = vmul.f32 %v2199_v36, %v922_v54 }
 0x164   : > { %723 = vrot.lane.b32.xlu0 %v721_v51, %s2806_s25  ;;  %s2810_s25 = smov 118  }
 0x165   : > { %v527_v55 = vpop.permute.xlu1 %526 }
 0x166   : > { %v532_v57 = vrot.slane %v527_v55, %v3133_v39 }
 0x168   : > { %925 = vrot.lane.b32.xlu0 %v923_v56, %s2807_s15  ;;  %v533_v59 = vmul.f32 %v3152_v53, %v532_v57  ;;  %s2811_s15 = smov 90  }
 0x16a   : > { %v934_v60 = vpop.permute.xlu1 %933 }
 0x16b   : > { %v939_v61 = vrot.slane %v934_v60, %v3133_v39 }
 0x16c   : > { %535 = vrot.lane.b32.xlu0 %v533_v59, %s2808_s24 }
 0x16d   : > { %v940_v63 = vmul.f32 %v2199_v36, %v939_v61 }
 0x16f   : > { %v544_v0 = vpop.permute.xlu1 %543 }
 0x170   : > { %v549_v2 = vrot.slane %v544_v0, %v3133_v39  ;;  %942 = vrot.lane.b32.xlu0 %v940_v63, %s2809_s23  ;;  %s2814_s23 = smov 33  }
 0x172   : > { %v550_v3 = vmul.f32 %v3152_v53, %v549_v2 }
 0x174   : > { %757 = vrot.lane.b32.xlu0 %v755_v1, %s2810_s25  ;;  %552 = vrot.lane.b32.xlu1 %v550_v3, %s2811_s15  ;;  %v951_v4 = vpop.permute.xlu1 %950 }
 0x175   : > { %v956_v5 = vrot.slane %v951_v4, %v3133_v39 }
 0x177   : > { %v957_v6 = vmul.f32 %v2199_v36, %v956_v5 }
 0x179   : > { %959 = vrot.lane.b32.xlu1 %v957_v6, %s2812_s13  ;;  %v589_v8 = vpop.permute.xlu1 %588  ;;  %s2813_s13 = smov 52  }
 0x17a   : > { %v594_v29 = vrot.slane %v589_v8, %v3133_v39 }
 0x17c   : > { %v595_v34 = vmul.f32 %v3136_v40, %v594_v29 }
 0x17e   : > { %v416_v9 = vpop.permute.xlu1 %415 }
 0x17f   : > { %v421_v48 = vrot.slane %v416_v9, %v3133_v39 }
 0x181   : > { %v422_v59 = vmul.f32 %v3152_v53, %v421_v48 }
 0x183   : > { %v3212_v10 = vpop.permute.xlu1 %560 }
 0x188   : > { %v3214_v12 = vpop.permute.xlu1 %765 }
 0x18d   : > { %v3216_v14 = vpop.permute.xlu1 %967 }
 0x196   : > { %v607_v16 = vpop.permute.xlu1 %606 }
 0x197   : > { %v608_v30 = vrot.slane %v607_v16, 1 }
 0x199   : > { %v609_v36 = vsel %vm436_vm0, %v607_v16, %v608_v30 }
 0x19a   : > { %v623_v18 = vpop.permute.xlu1 %622  ;;  %v611_v49 = vadd.f32 %v609_v36, %v595_v34 }
 0x19b   : > { %v808_v13 = vpop.permute.xlu0 %807  ;;  %v624_v41 = vrot.slane %v623_v18, 1 }
 0x19c   : > { %v809_v33 = vrot.slane %v808_v13, 1 }
 0x19d   : > { %v625_v50 = vsel %vm453_vm2, %v623_v18, %v624_v41 }
 0x19e   : > { %v810_v44 = vsel %vm470_vm1, %v808_v13, %v809_v33  ;;  %v627_v60 = vadd.f32 %v625_v50, %v611_v49 }
 0x19f   : > { %v824_v15 = vpop.permute.xlu0 %823  ;;  %v812_v46 = vadd.f32 %v810_v44, %v796_v42 }
 0x1a0   : > { %v434_v20 = vpop.permute.xlu1 %433  ;;  %v825_v45 = vrot.slane %v824_v15, 1 }
 0x1a1   : > { %v435_v51 = vrot.slane %v434_v20, 1 }
 0x1a2   : > { %v826_v55 = vsel %vm521_vm3, %v824_v15, %v825_v45 }
 0x1a3   : > { %v639_v17 = vpop.permute.xlu0 %638  ;;  %v437_v62 = vsel %vm436_vm0, %v434_v20, %v435_v51  ;;  %v828_v2 = vadd.f32 %v826_v55, %v812_v46 }
 0x1a4   : > { %v640_v47 = vrot.slane %v639_v17, 1  ;;  %v439_v11 = vadd.f32 %v437_v62, %v422_v59 }
 0x1a5   : > { %v3222_v22 = vpop.permute.xlu1 %839 }
 0x1a6   : > { %v642_v56 = vsel %vm641_vm4, %v639_v17, %v640_v47  ;;  %v841_v61 = vrot.slane %v3222_v22, 1  ;;  %vm743_vm4 = vcmask 973824  }
 0x1a7   : > { %v644_v3 = vadd.f32 %v642_v56, %v627_v60 }
 0x1a8   : > { %v843_v13 = vsel %vm842_vm5, %v3222_v22, %v841_v61  ;;  %vm911_vm5 = vcmask 15360  }
 0x1a9   : > { %v656_v24 = vpop.permute.xlu1 %655  ;;  %v845_v33 = vadd.f32 %v843_v13, %v828_v2 }
 0x1aa   : > { %v3218_v19 = vpop.permute.xlu0 %450  ;;  %v657_v52 = vrot.slane %v656_v24, 1 }
 0x1ab   : > { %v452_v57 = vrot.slane %v3218_v19, 1 }
 0x1ac   : > { %v659_v63 = vsel %vm658_vm6, %v656_v24, %v657_v52  ;;  %vm538_vm6 = vcmask 744448  }
 0x1ad   : > { %v454_v53 = vsel %vm453_vm2, %v3218_v19, %v452_v57  ;;  %v661_v15 = vadd.f32 %v659_v63, %v644_v3  ;;  %v566_v3 = vrot.slane %v3212_v10, %v3133_v39 }
 0x1ae   : > { %v456_v24 = vadd.f32 %v454_v53, %v439_v11 }
 0x1af   : > { %v3220_v21 = vpop.permute.xlu0 %856 }
 0x1b0   : > { %v858_v16 = vrot.slane %v3220_v21, 1 }
 0x1b3   : > { %v673_v23 = vpop.permute.xlu0 %672 }
 0x1b4   : > { %v3226_v26 = vpop.permute.xlu1 %467  ;;  %v674_v58 = vrot.slane %v673_v23, 1 }
 0x1b5   : > { %v469_v0 = vrot.slane %v3226_v26, 1 }
 0x1b6   : > { %v676_v6 = vsel %vm675_vm8, %v673_v23, %v674_v58 }
 0x1b7   : > { %v471_v17 = vsel %vm470_vm1, %v3226_v26, %v469_v0  ;;  %v678_v23 = vadd.f32 %v676_v6, %v661_v15 }
 0x1b8   : > { %v473_v36 = vadd.f32 %v471_v17, %v456_v24 }
 0x1b9   : > { %v3230_v28 = vpop.permute.xlu1 %873 }
 0x1ba   : > { %v875_v29 = vrot.slane %v3230_v28, 1 }
 0x1bd   : > { %v690_v35 = vpop.permute.xlu1 %689 }
 0x1be   : > { %v3224_v25 = vpop.permute.xlu0 %484  ;;  %v691_v1 = vrot.slane %v690_v35, 1 }
 0x1bf   : > { %v486_v8 = vrot.slane %v3224_v25, 1 }
 0x1c0   : > { %v693_v18 = vsel %vm692_vm9, %v690_v35, %v691_v1  ;;  %v860_v35 = vsel %vm859_vm7, %v3220_v21, %v858_v16  ;;  %vm928_vm7 = vcmask 916480   ;;  %vm760_vm9 = vcmask 965632  }
 0x1c1   : > { %v488_v22 = vsel %vm487_vm10, %v3224_v25, %v486_v8  ;;  %v695_v41 = vadd.f32 %v693_v18, %v678_v23  ;;  %v876_v25 = vsel %vm778_vm12, %v3230_v28, %v875_v29  ;;  %v862_v52 = vadd.f32 %v860_v35, %v845_v33  ;;  %v396_v33 = vld [vmem:[%s3064_s14 + $0x8] sm:$0x1f] }
 0x1c2   : > { %v490_v49 = vadd.f32 %v488_v22, %v473_v36  ;;  %v771_v8 = vrot.slane %v3214_v12, %v3133_v39  ;;  %v973_v23 = vrot.slane %v3216_v14, %v3133_v39  ;;  %v2815_v22 = vmov 0.0   ;;  %v1067_v35 = vld [vmem:[#allocation12] sm:$0xff]  ;;  %v3299_v14 = vld [vmem:[%s3527_s3] sm:$0xf] }
 0x1c3   : > { %v3228_v27 = vpop.permute.xlu0 %889  ;;  %v878_v56 = vadd.f32 %v876_v25, %v862_v52  ;;  %1060 = vmatprep.mubr.f32.mxu0 %v2815_v22  ;;  %v1076_v25 = vld [vmem:[#allocation12 + $0x48] sm:$0xff]  ;;  %v1079_v52 = vld [vmem:[#allocation12 + $0x60] sm:$0xff] }
 0x1c4   : > { %v891_v42 = vrot.slane %v3228_v27, 1 }
 0x1c7   : > { %v3234_v32 = vpop.permute.xlu0 %706 }
 0x1c8   : > { %v502_v40 = vpop.permute.xlu1 %501  ;;  %v708_v9 = vrot.slane %v3234_v32, 1 }
 0x1c9   : > { %v503_v20 = vrot.slane %v502_v40, 1 }
 0x1ca   : > { %v710_v34 = vsel %vm709_vm11, %v3234_v32, %v708_v9  ;;  %vm555_vm11 = vcmask 736256  }
 0x1cb   : > { %v505_v44 = vsel %vm504_vm13, %v502_v40, %v503_v20  ;;  %v712_v32 = vadd.f32 %v710_v34, %v695_v41  ;;  %v893_v40 = vsel %vm892_vm14, %v3228_v27, %v891_v42  ;;  %vm962_vm14 = vcmask 621568   ;;  %v1068_v34 = vld [vmem:[#allocation12 + $0x8] sm:$0xff]  ;;  %v1070_v41 = vld [vmem:[#allocation12 + $0x18] sm:$0xff] }
 0x1cc   : > { %v507_v46 = vadd.f32 %v505_v44, %v490_v49  ;;  %v2268_v42 = vpack.c.bf16 %v1070_v41, %v1067_v35  ;;  %v1074_v44 = vld [vmem:[#allocation12 + $0x38] sm:$0xff] }
 0x1cd   : > { %v909_v4 = vpop.permute.xlu1 %908  ;;  %v1078_v41 = vld [vmem:[#allocation12 + $0x58] sm:$0xff] }
 0x1ce   : > { %v910_v50 = vrot.slane %v909_v4, 7 }
 0x1d0   : > { %v912_v58 = vsel %vm911_vm5, %v910_v50, %v909_v4  ;;  %v1083_v50 = vld [vmem:[#allocation12 + $0x80] sm:$0xff]  ;;  %vm578_vm5 = vcmp.lt.s32.totalorder %v418_v37, 134  ;;  %v1069_v37 = vld [vmem:[#allocation12 + $0x10] sm:$0xff] }
 0x1d1   : > { %v741_v30 = vpop.permute.xlu1 %740 }
 0x1d2   : > { %v3239_v43 = vpop.permute.xlu0 %518  ;;  %v742_v47 = vrot.slane %v741_v30, 1 }
 0x1d3   : > { %v520_v26 = vrot.slane %v3239_v43, 1 }
 0x1d4   : > { %v744_v57 = vsel %vm743_vm4, %v741_v30, %v742_v47  ;;  %v395_v30 = vld [vmem:[%s3064_s14] sm:$0x1f]  ;;  %vm573_vm4 = vcmask 424960   ;;  %s2817_s14 = smov 19  }
 0x1d5   : > { %v522_v21 = vsel %vm521_vm3, %v3239_v43, %v520_v26  ;;  %v895_v43 = vadd.f32 %v893_v40, %v878_v56  ;;  %v1071_v26 = vld [vmem:[#allocation12 + $0x20] sm:$0xff]  ;;  %v1073_v47 = vld [vmem:[#allocation12 + $0x30] sm:$0xff] }
 0x1d6   : > { %v724_v54 = vpop.permute.xlu0 %723  ;;  %v524_v59 = vadd.f32 %v522_v21, %v507_v46  ;;  %v2266_v36 = vpack.c.bf16 %v1071_v26, %v1068_v34  ;;  %v2272_v49 = vpack.c.bf16 %v1076_v25, %v1073_v47  ;;  %v1082_v21 = vld [vmem:[#allocation12 + $0x78] sm:$0xff]  ;;  %v1085_v56 = vld [vmem:[#allocation12 + $0x90] sm:$0xff]  ;;  %v1084_v47 = vld [vmem:[#allocation12 + $0x88] sm:$0xff] }
 0x1d7   : > { %v725_v19 = vrot.slane %v724_v54, 1  ;;  %v914_v53 = vadd.f32 %v912_v58, %v895_v43  ;;  %v2276_v40 = vpack.c.bf16 %v1082_v21, %v1079_v52  ;;  %v1086_v46 = vld [vmem:[#allocation12 + $0x98] sm:$0xff]  ;;  %v1092_v58 = vld [vmem:[#allocation12 + $0xc8] sm:$0xff]  ;;  %v1087_v25 = vld [vmem:[#allocation12 + $0xa0] sm:$0xff] }
 0x1d8   : > { %2267 = vmatprep.subr.bf16.mxu1 %v2266_v36  ;;  %v1075_v36 = vld [vmem:[#allocation12 + $0x40] sm:$0xff]  ;;  %v1102_v21 = vld [vmem:[#allocation12 + $0x118] sm:$0xff] }
 0x1d9   : > { %v727_v45 = vsel %vm726_vm15, %v724_v54, %v725_v19  ;;  %vm945_vm15 = vcmask 769024   ;;  %2269 = vmatpush1.bf16.msra.mxu1 %v2268_v42  ;;  %v2816_v42 = vmov 0.0|0.0   ;;  %v1099_v52 = vld [vmem:[#allocation12 + $0x100] sm:$0xff] }
 0x1da   : > { %v926_v5 = vpop.permute.xlu0 %925  ;;  %v729_v54 = vadd.f32 %v727_v45, %v712_v32  ;;  %v1077_v45 = vld [vmem:[#allocation12 + $0x50] sm:$0xff]  ;;  %v1080_v32 = vld [vmem:[#allocation12 + $0x68] sm:$0xff] }
 0x1db   : > { %v927_v55 = vrot.slane %v926_v5, 1 }
 0x1dc   : > { %v746_v27 = vadd.f32 %v744_v57, %v729_v54  ;;  %v1089_v54 = vld [vmem:[#allocation12 + $0xb0] sm:$0xff]  ;;  %v1088_v57 = vld [vmem:[#allocation12 + $0xa8] sm:$0xff] }
 0x1dd   : > { %v929_v1 = vsel %vm928_vm7, %v926_v5, %v927_v55  ;;  %v2278_v55 = vpack.c.bf16 %v1089_v54, %v1086_v46  ;;  %vm408_vm7 = vcmask 45056   ;;  %v1105_v46 = vld [vmem:[#allocation12 + $0x130] sm:$0xff]  ;;  %v1108_v54 = vld [vmem:[#allocation12 + $0x148] sm:$0xff] }
 0x1de   : > { %v536_v31 = vpop.permute.xlu0 %535  ;;  %v931_v15 = vadd.f32 %v929_v1, %v914_v53  ;;  %v1097_v1 = vld [vmem:[#allocation12 + $0xf0] sm:$0xff]  ;;  %v1104_v53 = vld [vmem:[#allocation12 + $0x128] sm:$0xff] }
 0x1df   : > { %v537_v48 = vrot.slane %v536_v31, 1 }
 0x1e1   : > { %v539_v28 = vsel %vm538_vm6, %v536_v31, %v537_v48  ;;  %v2270_v48 = vpack.c.bf16 %v1077_v45, %v1074_v44  ;;  %v2302_v44 = vpack.c.bf16 %v1078_v41, %v1075_v36  ;;  %v1081_v45 = vld [vmem:[#allocation12 + $0x70] sm:$0xff] }
 0x1e2   : > { %v943_v51 = vpop.permute.xlu0 %942  ;;  %v541_v2 = vadd.f32 %v539_v28, %v524_v59  ;;  %v2280_v28 = vpack.c.bf16 %v1088_v57, %v1085_v56  ;;  %v1095_v59 = vld [vmem:[#allocation12 + $0xe0] sm:$0xff]  ;;  %v1109_v56 = vld [vmem:[#allocation12 + $0x150] sm:$0xff]  ;;  %v1112_v57 = vld [vmem:[#allocation12 + $0x168] sm:$0xff] }
 0x1e3   : > { %v944_v60 = vrot.slane %v943_v51, 1  ;;  %2271 = vmatprep.subr.bf16.mxu1 %v2270_v48  ;;  %v2305_v48 = vpack.c.bf16 %v1084_v47, %v1081_v45 }
 0x1e4   : > { %2273 = vmatpush1.bf16.msra.mxu1 %v2272_v49  ;;  %v1090_v49 = vld [vmem:[#allocation12 + $0xb8] sm:$0xff] }
 0x1e5   : > { %v946_v9 = vsel %vm945_vm15, %v943_v51, %v944_v60  ;;  %v2274_v51 = vpack.c.bf16 %v1083_v50, %v1080_v32  ;;  %v2282_v60 = vpack.c.bf16 %v1095_v59, %v1092_v58  ;;  %vm993_vm15 = vcmask 64512   ;;  %v1096_v50 = vld [vmem:[#allocation12 + $0xe8] sm:$0xff]  ;;  %v1114_v59 = vld [vmem:[#allocation12 + $0x178] sm:$0xff] }
 0x1e6   : > { %v758_v61 = vpop.permute.xlu0 %757  ;;  %v553_v62 = vpop.permute.xlu1 %552  ;;  %v948_v10 = vadd.f32 %v946_v9, %v931_v15  ;;  %v1106_v9 = vld [vmem:[#allocation12 + $0x138] sm:$0xff]  ;;  %v1113_v15 = vld [vmem:[#allocation12 + $0x170] sm:$0xff]  ;;  %v2308_v32 = vpack.c.bf16 %v1090_v49, %v1087_v25  ;;  %v2296_v58 = vpack.c.bf16 %v1112_v57, %v1109_v56 }
 0x1e7   : > { %v759_v63 = vrot.slane %v758_v61, 1  ;;  %v554_v0 = vrot.slane %v553_v62, 1  ;;  %2275 = vmatprep.subr.bf16.mxu1 %v2274_v51 }
 0x1e8   : > { %2277 = vmatpush1.bf16.msra.mxu1 %v2276_v40  ;;  %v2314_v40 = vpack.c.bf16 %v1102_v21, %v1099_v52 }
 0x1e9   : > { %v761_v6 = vsel %vm760_vm9, %v758_v61, %v759_v63  ;;  %v556_v4 = vsel %vm555_vm11, %v553_v62, %v554_v0  ;;  %2279 = vmatprep.subr.bf16.mxu1 %v2278_v55  ;;  %v1091_v61 = vld [vmem:[#allocation12 + $0xc0] sm:$0xff]  ;;  %v1094_v62 = vld [vmem:[#allocation12 + $0xd8] sm:$0xff]  ;;  %v1101_v0 = vld [vmem:[#allocation12 + $0x110] sm:$0xff]  ;;  %vm403_vm9 = vcmask 269312   ;;  %v2317_v55 = vpack.c.bf16 %v1108_v54, %v1105_v46 }
 0x1ea   : > { %v763_v11 = vadd.f32 %v761_v6, %v746_v27  ;;  %v558_v13 = vadd.f32 %v556_v4, %v541_v2  ;;  %v2284_v43 = vpack.c.bf16 %v1094_v62, %v1091_v61  ;;  %v1098_v63 = vld [vmem:[#allocation12 + $0xf8] sm:$0xff]  ;;  %v1100_v2 = vld [vmem:[#allocation12 + $0x108] sm:$0xff]  ;;  %v1107_v6 = vld [vmem:[#allocation12 + $0x140] sm:$0xff] }
 0x1eb   : > { %v960_v16 = vpop.permute.xlu1 %959  ;;  %v2286_v27 = vpack.c.bf16 %v1101_v0, %v1098_v63  ;;  %v2290_v4 = vpack.c.bf16 %v1107_v6, %v1104_v53  ;;  %v1116_v61 = vld [vmem:[#allocation12 + $0x188] sm:$0x3f]  ;;  %v1115_v62 = vld [vmem:[#allocation12 + $0x180] sm:$0x3f]  ;;  %v1274_v6 = vld [vmem:[%s3074_s16 + $0x8] sm:$0xf] }
 0x1ec   : > { %v961_v5 = vrot.slane %v960_v16, 1  ;;  %v772_v17 = vadd.f32 %v771_v8, %v763_v11  ;;  %v567_v18 = vadd.f32 %v566_v3, %v558_v13  ;;  %2281 = vmatpush1.bf16.msra.mxu1 %v2280_v28  ;;  %v2288_v3 = vpack.c.bf16 %v1100_v2, %v1097_v1  ;;  %v1103_v8 = vld [vmem:[#allocation12 + $0x120] sm:$0xff]  ;;  %v1110_v13 = vld [vmem:[#allocation12 + $0x158] sm:$0xff] }
 0x1ed   : > { %2283 = vmatprep.subr.bf16.mxu1 %v2282_v60  ;;  %v2292_v11 = vpack.c.bf16 %v1106_v9, %v1103_v8  ;;  %v1111_v28 = vld [vmem:[#allocation12 + $0x160] sm:$0xff] }
 0x1ee   : > { %v963_v20 = vsel %vm962_vm14, %v960_v16, %v961_v5  ;;  %v773_v19 = vmax.f32 %v772_v17, 0.0  ;;  %v568_v24 = vmax.f32 %v567_v18, 0.0  ;;  %v2294_v16 = vpack.c.bf16 %v1113_v15, %v1110_v13  ;;  %v1273_v63 = vld [vmem:[%s3074_s16] sm:$0xff] }
 0x1ef   : > { %v965_v29 = vadd.f32 %v963_v20, %v948_v10  ;;  %v2320_v60 = vpack.c.bf16 %v1114_v59, %v1111_v28  ;;  %v1277_v0 = vcombine.high %v1273_v63, %v1273_v63  ;;  %vm387_vm14 = vcmask 154624  }
 0x1f0   : > { %775 = vrot.lane.b32.xlu1 %v773_v19, %s2798_s4  ;;  %570 = vrot.lane.b32.xlu0 %v568_v24, %s2813_s13  ;;  %388 = vst.msk [vmem:[#allocation3] sm:$0xff] %vm387_vm14, %v2815_v22 }
 0x1f1   : > { %v974_v12 = vadd.f32 %v973_v23, %v965_v29  ;;  %2285 = vmatpush1.bf16.msra.mxu1 %v2284_v43  ;;  %v1117_v43 = vld [vmem:[#allocation12 + $0x190] sm:$0x3f] }
 0x1f2   : > { %2287 = vmatprep.subr.bf16.mxu1 %v2286_v27 }
 0x1f3   : > { %v975_v31 = vmax.f32 %v974_v12, 0.0 }
 0x1f4   : > { %399 = vrot.lane.b32.xlu1 %v395_v30, %s2814_s23 }
 0x1f5   : > { %977 = vrot.lane.b32.xlu0 %v975_v31, %s2797_s17  ;;  %2289 = vmatpush1.bf16.msra.mxu1 %v2288_v3  ;;  %s2060_s17 = scalar_lea.sflag [#allocation8], %s3060_s18 }
 0x1f6   : > { %2291 = vmatprep.subr.bf16.mxu1 %v2290_v4 }
 0x1f8   : > { %990 = vperm.xlu1 %2543, %v3299_v14  }
 0x1f9   : > { %401 = vrot.lane.b32.xlu0 %v396_v33, %s2814_s23  ;;  %2293 = vmatpush1.bf16.msra.mxu1 %v2292_v11  ;;  %v1072_v33 = vld [vmem:[#allocation12 + $0x28] sm:$0xff] }
 0x1fa   : > { %2295 = vmatprep.subr.bf16.mxu1 %v2294_v16  ;;  %v2299_v26 = vpack.c.bf16 %v1072_v33, %v1069_v37 }
 0x1fc   : > { %2545 = vset.pattern.permute.xlu1 %v2759_v7 }
 0x1fd   : > { %2297 = vmatpush1.bf16.msra.mxu1 %v2296_v58  ;;  %1278 = vrot.lane.b32.xlu0 %v1273_v63, %s2817_s14 }
 0x1fe   : > { %1280 = vrot.lane.b32.xlu1 %v1277_v0, %s2817_s14 }
 0x201   : > { %1282 = vrot.lane.b32.xlu0 %v1274_v6, %s2817_s14 }
 0x262   : > { %v571_v5 = vpop.permute.xlu0 %570  ;;  %v776_v17 = vpop.permute.xlu1 %775 }
 0x263   : > { %v572_v18 = vrot.slane %v571_v5, 1  ;;  %v777_v10 = vrot.slane %v776_v17, 1 }
 0x265   : > { %v574_v20 = vsel %vm573_vm4, %v571_v5, %v572_v18  ;;  %v779_v19 = vsel %vm778_vm12, %v776_v17, %v777_v10  ;;  %vm1118_vm12 = vcmask 48128   ;;  %vm1289_vm4 = vcmask 1043608  }
 0x266   : > { %581 = vst.msk [vmem:[#allocation2 + $0x5] ss:$8 sm:$0x3] %vm578_vm5, %v574_v20  ;;  %782 = vst.msk [vmem:[#allocation2 + $0x6] ss:$8 sm:$0x3] %vm578_vm5, %v779_v19  ;;  %v400_v29 = vpop.permute.xlu1 %399 }
 0x267   : > { %v978_v24 = vpop.permute.xlu0 %977 }
 0x268   : > { %v979_v23 = vrot.slane %v978_v24, 1 }
 0x26a   : > { %v980_v12 = vsel %vm675_vm8, %v978_v24, %v979_v23  ;;  %vm1122_vm8 = vcmask 1045504  }
 0x26b   : > { %983 = vst.msk [vmem:[#allocation2 + $0x7] ss:$8 sm:$0x3] %vm578_vm5, %v980_v12  ;;  %v402_v30 = vpop.permute.xlu0 %401  ;;  %2201 = vmatprep.subr.msk.mxu1 %vm1122_vm8, %v1116_v61  ;;  %vm389_vm5 = vcmask 572824  }
 0x26c   : > { %409 = vst.msk [vmem:[#allocation2 + $0x8] sm:$0x1f] %vm408_vm7, %v402_v30  ;;  %v404_v31 = vsel %vm403_vm9, %v400_v29, %v402_v30  ;;  %2202 = vmatpush1.msk.msra.mxu1 %vm1122_vm8, %v1115_v62  ;;  %vm1292_vm7 = vcmask 412672   ;;  %vm1314_vm9 = vcmask 1047708  }
 0x26d   : > { %407 = vst [vmem:[#allocation2] sm:$0x1f] %v404_v31  ;;  %390 = vst.msk [vmem:[#allocation3 + $0x10] sm:$0xff] %vm389_vm5, %v2815_v22  ;;  %vm1520_vm5 = vcmask 588800  }
 0x26f   : > { %v1279_v4 = vpop.permute.xlu0 %1278 }
 0x270   : > { %1290 = vst.msk [vmem:[#allocation3] sm:$0xf] %vm1289_vm4, %v1279_v4 }
 0x273   : > { %v987_v34 = vld [vmem:[#allocation2 + $0x8] sm:$0xff]  ;;  %v1283_v11 = vpop.permute.xlu0 %1282 }
 0x274   : > { %996 = vmatprep.subr.mxu0 %v987_v34  ;;  %v986_v35 = vld [vmem:[#allocation2] sm:$0xff] }
 0x275   : > { %997 = vmatpush1.msra.mxu0 %v986_v35  ;;  %v1514_v35 = vld [vmem:[%s3530_s6] sm:$0xf] }
 0x276   : > { %2200 = vmatmul.mubr.msk.f32.vlgmr.msra.gmra.mrb[0].mxu0 %vm993_vm15, %v3299_v14  ;;  %2298 = vmatprep.subr.bf16.mxu0 %v2816_v42  ;;  %v1093_v14 = vld [vmem:[#allocation12 + $0xd0] sm:$0xff]  ;;  %vm1317_vm15 = vcmask 416772  }
 0x277   : > { %2300 = vmatpush1.bf16.msra.mxu0 %v2299_v26  ;;  %v2311_v51 = vpack.c.bf16 %v1096_v50, %v1093_v14  ;;  %v991_v27 = vpop.permute.xlu1 %990 }
 0x278   : > { %2301 = vmatprep.subr.bf16.mxu0 %v2816_v42 }
 0x27b   : > { %2303 = vmatpush1.bf16.msra.mxu0 %v2302_v44  ;;  %v1281_v8 = vpop.permute.xlu1 %1280 }
 0x27c   : > { %2304 = vmatprep.subr.bf16.mxu0 %v2816_v42  ;;  %v1284_v9 = vsel %vm387_vm14, %v1279_v4, %v1281_v8  ;;  %v1285_v13 = vsel %vm387_vm14, %v1281_v8, %v1283_v11 }
 0x27d   : > { %1291 = vst [vmem:[#allocation3 + $0x8] sm:$0xf] %v1284_v9  ;;  %1293 = vst.msk [vmem:[#allocation3 + $0x10] sm:$0xf] %vm1292_vm7, %v1285_v13 }
 0x27f   : > { %2306 = vmatpush1.bf16.msra.mxu0 %v2305_v48 }
 0x280   : > { %2307 = vmatprep.subr.bf16.mxu0 %v2816_v42 }
 0x283   : > { %2309 = vmatpush1.bf16.msra.mxu0 %v2308_v32 }
 0x284   : > { %2310 = vmatprep.subr.bf16.mxu0 %v2816_v42 }
 0x287   : > { %2312 = vmatpush1.bf16.msra.mxu0 %v2311_v51 }
 0x288   : > { %2313 = vmatprep.subr.bf16.mxu0 %v2816_v42 }
 0x28b   : > { %2315 = vmatpush1.bf16.msra.mxu0 %v2314_v40 }
 0x28c   : > { %2316 = vmatprep.subr.bf16.mxu0 %v2816_v42 }
 0x28f   : > { %2318 = vmatpush1.bf16.msra.mxu0 %v2317_v55 }
 0x290   : > { %2319 = vmatprep.subr.bf16.mxu0 %v2816_v42 }
 0x293   : > { %2321 = vmatpush1.bf16.msra.mxu0 %v2320_v60 }
 0x294   : > { %1235 = vmatprep.subr.mxu0 %v2815_v22 }
 0x297   : > { %2204 = vmatpush1.msk.msra.mxu0 %vm1122_vm8, %v1117_v43  ;;  %vm1325_vm8 = vcmask 261120  }
 0x298   : > { %2338 = vmatprep.subr.bf16.mxu0 %v2816_v42 }
 0x349   : > { %v1062_v1 = vpop.f32.mrb[0].mxu0 }
 0x34a   : > { %v1064_v2 = vpop.f32.mrb[1].mxu0  ;;  %v1063_v53 = vadd.f32 %v1062_v1, %v991_v27 }
 0x34b   : > { %v1065_v3 = vadd.f32 %v1064_v2, %v991_v27 }
 0x34d   : > { %2203 = vmatprep.mubr.msk.f32.mxu1 %vm1118_vm12, %v1065_v3  ;;  %2205 = vmatprep.mubr.msk.f32.mxu0 %vm1118_vm12, %v1065_v3  ;;  %vm2818_vm12 = vmmov 0  }
 0x34e   : > { %1197 = vmatmul.mubr.f32.vlgmr.msra.gmra.mrb[0].mxu1 %v1063_v53  ;;  %1268 = vmatmul.mubr.f32.vlgmr.msra.gmra.mrb[2].mxu0 %v1063_v53 }
 0x34f   : > { %1588 = vmatprep.mubr.f32.mxu1 %v2815_v22  ;;  %2250 = vmatprep.mubr.msk.f32.mxu0 %vm2818_vm12, %v2815_v22 }
 0x421   : > { %v1198_v15 = vpop.f32.mrb[0].mxu1  ;;  %v1269_v16 = vpop.f32.mrb[2].mxu0 }
 0x422   : > { %v1294_v5 = vmax.f32 %v1198_v15, 0.0  ;;  %v1200_v17 = vpop.f32.mrb[1].mxu1  ;;  %v1271_v18 = vpop.f32.mrb[3].mxu0  ;;  %v1296_v19 = vmax.f32 %v1269_v16, 0.0 }
 0x423   : > { %v1295_v10 = vmax.f32 %v1200_v17, 0.0 }
 0x424   : > { %v1300_v20 = vrot.slane %v1294_v5, 4  ;;  %v1302_v23 = vrot.slane %v1296_v19, 4 }
 0x425   : > { %v1301_v24 = vrot.slane %v1295_v10, 4 }
 0x426   : > { %1303 = vrot.lane.b32.xlu1 %v1300_v20, %s2817_s14 }
 0x427   : > { %1305 = vrot.lane.b32.xlu0 %v1301_v24, %s2817_s14 }
 0x42a   : > { %1307 = vrot.lane.b32.xlu1 %v1302_v23, %s2817_s14 }
 0x498   : > { %v1304_v29 = vpop.permute.xlu1 %1303 }
 0x499   : > { %1315 = vst.msk [vmem:[#allocation3] sm:$0xf0] %vm1314_vm9, %v1304_v29  ;;  %v1306_v12 = vpop.permute.xlu0 %1305  ;;  %vm391_vm9 = vcmask 150528  }
 0x49a   : > { %v1309_v30 = vsel %vm387_vm14, %v1304_v29, %v1306_v12  ;;  %392 = vst.msk [vmem:[#allocation4] sm:$0xf] %vm391_vm9, %v2815_v22 }
 0x49b   : > { %1316 = vst [vmem:[#allocation3 + $0x8] sm:$0xf0] %v1309_v30 }
 0x49c   : > { %v1308_v31 = vpop.permute.xlu1 %1307 }
 0x49d   : > { %v1310_v37 = vsel %vm387_vm14, %v1306_v12, %v1308_v31 }
 0x49e   : > { %1318 = vst.msk [vmem:[#allocation3 + $0x10] sm:$0xf0] %vm1317_vm15, %v1310_v37  ;;  %vm393_vm15 = vcmask 568728  }
 0x49f   : > { %394 = vst.msk [vmem:[#allocation4 + $0x8] sm:$0xf] %vm393_vm15, %v2815_v22 }
 0x4a0   : > { %v1320_v33 = vld [vmem:[#allocation3] sm:$0xff] }
 0x4a1   : > { %1323 = vst [vmem:[#allocation5] sm:$0xff] %v1320_v33  ;;  %1353 = vrot.lane.b32.xlu1 %v1320_v33, %s2790_s26  ;;  %1333 = vrot.lane.b32.xlu0 %v1320_v33, %s2789_s11 }
 0x4a2   : > { %v1321_v34 = vld [vmem:[#allocation3 + $0x8] sm:$0xff] }
 0x4a3   : > { %1324 = vst [vmem:[#allocation5 + $0x8] sm:$0xff] %v1321_v34 }
 0x4a5   : > { %v1322_v26 = vld [vmem:[#allocation3 + $0x10] sm:$0xff]  ;;  %1393 = vrot.lane.b32.xlu1 %v1320_v33, %s2800_s0  ;;  %1373 = vrot.lane.b32.xlu0 %v1320_v33, %s2791_s20 }
 0x4a6   : > { %1326 = vst.msk [vmem:[#allocation5 + $0x10] sm:$0xff] %vm1325_vm8, %v1322_v26 }
 0x4a9   : > { %1433 = vrot.lane.b32.xlu1 %v1320_v33, %s2792_s21  ;;  %1413 = vrot.lane.b32.xlu0 %v1320_v33, %s2803_s2 }
 0x4ad   : > { %1337 = vrot.lane.b32.xlu1 %v1322_v26, %s2789_s11  ;;  %1335 = vrot.lane.b32.xlu0 %v1321_v34, %s2789_s11  ;;  %v1489_v55 = vld [vmem:[#allocation5 + $0x10] sm:$0xff] }
 0x4b1   : > { %1355 = vrot.lane.b32.xlu1 %v1321_v34, %s2790_s26  ;;  %1357 = vrot.lane.b32.xlu0 %v1322_v26, %s2790_s26 }
 0x4b5   : > { %1375 = vrot.lane.b32.xlu1 %v1321_v34, %s2791_s20  ;;  %1377 = vrot.lane.b32.xlu0 %v1322_v26, %s2791_s20 }
 0x4b9   : > { %1395 = vrot.lane.b32.xlu1 %v1321_v34, %s2800_s0  ;;  %1397 = vrot.lane.b32.xlu0 %v1322_v26, %s2800_s0 }
 0x4bd   : > { %1415 = vrot.lane.b32.xlu1 %v1321_v34, %s2803_s2  ;;  %1417 = vrot.lane.b32.xlu0 %v1322_v26, %s2803_s2 }
 0x4c1   : > { %1435 = vrot.lane.b32.xlu1 %v1321_v34, %s2792_s21  ;;  %1437 = vrot.lane.b32.xlu0 %v1322_v26, %s2792_s21 }
 0x4c5   : > { %1455 = vrot.lane.b32.xlu1 %v1321_v34, %s2808_s24  ;;  %1457 = vrot.lane.b32.xlu0 %v1322_v26, %s2808_s24 }
 0x4c9   : > { %1475 = vrot.lane.b32.xlu1 %v1321_v34, %s2811_s15  ;;  %1453 = vrot.lane.b32.xlu0 %v1320_v33, %s2808_s24 }
 0x4cd   : > { %1473 = vrot.lane.b32.xlu1 %v1320_v33, %s2811_s15  ;;  %1477 = vrot.lane.b32.xlu0 %v1322_v26, %s2811_s15 }
 0x4d1   : > { %1517 = vperm.xlu0 %2544, %v1514_v35  }
 0x4d5   : > { %2546 = vset.pattern.permute.xlu0 %v2759_v7 }
 0x513   : > { %v1354_v36 = vpop.permute.xlu1 %1353  ;;  %v1334_v41 = vpop.permute.xlu0 %1333 }
 0x517   : > { %v1394_v44 = vpop.permute.xlu1 %1393  ;;  %v1374_v45 = vpop.permute.xlu0 %1373 }
 0x51b   : > { %v1434_v47 = vpop.permute.xlu1 %1433  ;;  %v1414_v48 = vpop.permute.xlu0 %1413 }
 0x51f   : > { %v1338_v25 = vpop.permute.xlu1 %1337  ;;  %v1336_v49 = vpop.permute.xlu0 %1335 }
 0x520   : > { %1346 = vst.msk [vmem:[#allocation5 + $0x28] sm:$0xff] %vm1325_vm8, %v1338_v25  ;;  %v1339_v32 = vsel %vm436_vm0, %v1334_v41, %v1336_v49  ;;  %v1340_v14 = vsel %vm436_vm0, %v1336_v49, %v1338_v25 }
 0x521   : > { %1344 = vst [vmem:[#allocation5 + $0x18] sm:$0xff] %v1339_v32  ;;  %1345 = vst [vmem:[#allocation5 + $0x20] sm:$0xff] %v1340_v14  ;;  %v2322_v50 = vpack.c.bf16 %v1340_v14, %v1321_v34  ;;  %v2324_v51 = vpack.c.bf16 %v1339_v32, %v1320_v33 }
 0x523   : > { %v1356_v52 = vpop.permute.xlu1 %1355  ;;  %v1358_v7 = vpop.permute.xlu0 %1357  ;;  %2323 = vmatprep.subr.bf16.mxu1 %v2322_v50 }
 0x524   : > { %v1359_v21 = vsel %vm453_vm2, %v1354_v36, %v1356_v52  ;;  %v1360_v40 = vsel %vm453_vm2, %v1356_v52, %v1358_v7  ;;  %1366 = vst.msk [vmem:[#allocation5 + $0x40] sm:$0xff] %vm1325_vm8, %v1358_v7  ;;  %2325 = vmatpush1.bf16.msra.mxu1 %v2324_v51  ;;  %v1319_v36 = vld [vmem:[%s3529_s5] sm:$0xf]  ;;  %v1680_v7 = vsub.s32 2, %v3130_v38 }
 0x525   : > { %1364 = vst [vmem:[#allocation5 + $0x30] sm:$0xff] %v1359_v21  ;;  %1365 = vst [vmem:[#allocation5 + $0x38] sm:$0xff] %v1360_v40 }
 0x527   : > { %v1376_v46 = vpop.permute.xlu1 %1375  ;;  %v1378_v54 = vpop.permute.xlu0 %1377  ;;  %v1492_v56 = vld [vmem:[#allocation5 + $0x28] sm:$0xff] }
 0x528   : > { %v1379_v57 = vsel %vm470_vm1, %v1374_v45, %v1376_v46  ;;  %v1380_v28 = vsel %vm470_vm1, %v1376_v46, %v1378_v54  ;;  %1386 = vst.msk [vmem:[#allocation5 + $0x58] sm:$0xff] %vm1325_vm8, %v1378_v54  ;;  %v2339_v58 = vpack.c.bf16 %v1492_v56, %v1489_v55  ;;  %v1668_v45 = vld [vmem:[%s3531_s7] sm:$0x7] }
 0x529   : > { %1384 = vst [vmem:[#allocation5 + $0x48] sm:$0xff] %v1379_v57  ;;  %1385 = vst [vmem:[#allocation5 + $0x50] sm:$0xff] %v1380_v28  ;;  %v2326_v59 = vpack.c.bf16 %v1380_v28, %v1360_v40  ;;  %v2328_v60 = vpack.c.bf16 %v1379_v57, %v1359_v21  ;;  %v1673_v49 = vrot.slane %v1668_v45, %v3133_v39 }
 0x52a   : > { %2340 = vmatpush3.bf16.msra.mxu0 %v2339_v58  ;;  %v1681_v28 = vrot.slane %v1668_v45, %v1680_v7 }
 0x52b   : > { %v1396_v61 = vpop.permute.xlu1 %1395  ;;  %v1398_v62 = vpop.permute.xlu0 %1397  ;;  %2341 = vmatprep.subr.bf16.mxu0 %v2816_v42  ;;  %2327 = vmatprep.subr.bf16.mxu1 %v2326_v59  ;;  %v1495_v1 = vld [vmem:[#allocation5 + $0x40] sm:$0xff] }
 0x52c   : > { %v1399_v43 = vsel %vm487_vm10, %v1394_v44, %v1396_v61  ;;  %v1400_v63 = vsel %vm487_vm10, %v1396_v61, %v1398_v62  ;;  %1406 = vst.msk [vmem:[#allocation5 + $0x70] sm:$0xff] %vm1325_vm8, %v1398_v62  ;;  %2329 = vmatpush1.bf16.msra.mxu1 %v2328_v60 }
 0x52d   : > { %1404 = vst [vmem:[#allocation5 + $0x60] sm:$0xff] %v1399_v43  ;;  %1405 = vst [vmem:[#allocation5 + $0x68] sm:$0xff] %v1400_v63 }
 0x52f   : > { %v1416_v0 = vpop.permute.xlu1 %1415  ;;  %v1418_v27 = vpop.permute.xlu0 %1417  ;;  %v1498_v2 = vld [vmem:[#allocation5 + $0x58] sm:$0xff] }
 0x530   : > { %v1419_v3 = vsel %vm504_vm13, %v1414_v48, %v1416_v0  ;;  %v1420_v53 = vsel %vm504_vm13, %v1416_v0, %v1418_v27  ;;  %1426 = vst.msk [vmem:[#allocation5 + $0x88] sm:$0xff] %vm1325_vm8, %v1418_v27  ;;  %v2342_v6 = vpack.c.bf16 %v1498_v2, %v1495_v1 }
 0x531   : > { %v2330_v4 = vpack.c.bf16 %v1420_v53, %v1400_v63  ;;  %v2332_v8 = vpack.c.bf16 %v1419_v3, %v1399_v43 }
 0x532   : > { %2343 = vmatpush3.bf16.msra.mxu0 %v2342_v6 }
 0x533   : > { %v1436_v9 = vpop.permute.xlu1 %1435  ;;  %v1438_v11 = vpop.permute.xlu0 %1437  ;;  %2344 = vmatprep.subr.bf16.mxu0 %v2816_v42  ;;  %2331 = vmatprep.subr.bf16.mxu1 %v2330_v4  ;;  %v1501_v17 = vld [vmem:[#allocation5 + $0x70] sm:$0xff] }
 0x534   : > { %v1439_v13 = vsel %vm521_vm3, %v1434_v47, %v1436_v9  ;;  %v1440_v15 = vsel %vm521_vm3, %v1436_v9, %v1438_v11  ;;  %1446 = vst.msk [vmem:[#allocation5 + $0xa0] sm:$0xff] %vm1325_vm8, %v1438_v11  ;;  %2333 = vmatpush1.bf16.msra.mxu1 %v2332_v8  ;;  %v1676_v47 = vsub.s32 1, %v3130_v38  ;;  %v1705_v9 = vld [vmem:[%s3529_s5] sm:$0xf] }
 0x535   : > { %v1887_v11 = vld [vmem:[%s3530_s6] sm:$0xf] }
 0x536   : > { %v1677_v50 = vrot.slane %v1668_v45, %v1676_v47 }
 0x537   : > { %v1456_v16 = vpop.permute.xlu1 %1455  ;;  %v1458_v5 = vpop.permute.xlu0 %1457  ;;  %v1504_v18 = vld [vmem:[#allocation5 + $0x88] sm:$0xff] }
 0x538   : > { %v1460_v10 = vsel %vm538_vm6, %v1456_v16, %v1458_v5  ;;  %1466 = vst.msk [vmem:[#allocation5 + $0xb8] sm:$0xff] %vm1325_vm8, %v1458_v5  ;;  %v2345_v20 = vpack.c.bf16 %v1504_v18, %v1501_v17 }
 0x539   : > { %v2334_v19 = vpack.c.bf16 %v1460_v10, %v1440_v15 }
 0x53a   : > { %2346 = vmatpush3.bf16.msra.mxu0 %v2345_v20 }
 0x53b   : > { %v1476_v24 = vpop.permute.xlu1 %1475  ;;  %v1454_v23 = vpop.permute.xlu0 %1453  ;;  %2347 = vmatprep.subr.bf16.mxu0 %v2816_v42  ;;  %2335 = vmatprep.subr.bf16.mxu1 %v2334_v19  ;;  %v1507_v37 = vld [vmem:[#allocation5 + $0xa0] sm:$0xff] }
 0x53c   : > { %v1459_v29 = vsel %vm538_vm6, %v1454_v23, %v1456_v16 }
 0x53d   : > { %v2336_v12 = vpack.c.bf16 %v1459_v29, %v1439_v13 }
 0x53f   : > { %v1474_v30 = vpop.permute.xlu1 %1473  ;;  %v1478_v31 = vpop.permute.xlu0 %1477  ;;  %v1510_v33 = vld [vmem:[#allocation5 + $0xb8] sm:$0xff]  ;;  %2337 = vmatpush1.bf16.msra.mxu1 %v2336_v12 }
 0x540   : > { %v1479_v34 = vsel %vm555_vm11, %v1474_v30, %v1476_v24  ;;  %v1480_v26 = vsel %vm555_vm11, %v1476_v24, %v1478_v31  ;;  %1486 = vst.msk [vmem:[#allocation5 + $0xd0] sm:$0xff] %vm1325_vm8, %v1478_v31  ;;  %v2348_v35 = vpack.c.bf16 %v1510_v33, %v1507_v37  ;;  %vm1701_vm8 = vcmask 1047556  }
 0x541   : > { %1540 = vmatprep.subr.mxu1 %v1480_v26 }
 0x542   : > { %2349 = vmatpush3.bf16.msra.mxu0 %v2348_v35 }
 0x543   : > { %2248 = vmatprep.subr.mxu0 %v2815_v22  ;;  %1541 = vmatpush1.msra.mxu1 %v1479_v34 }
 0x544   : > { %2206 = vmatmul.mubr.msk.f32.vlgmr.msra.gmra.mrb[2].mxu1 %vm1520_vm5, %v1319_v36 }
 0x545   : > { %1973 = vmatprep.mubr.f32.mxu1 %v2815_v22 }
 0x547   : > { %v1513_v41 = vld [vmem:[#allocation5 + $0xd0] sm:$0xff] }
 0x548   : > { %2249 = vmatpush3.msra.mxu0 %v1513_v41 }
 0x549   : > { %2251 = vmatmul.mubr.msk.f32.vlgmr.msra.gmra.mrb[4].mxu0 %vm1520_vm5, %v1319_v36  ;;  %2358 = vmatprep.subr.bf16.mxu0 %v2816_v42  ;;  %vm1713_vm5 = vcmask 257024  }
 0x54a   : > { %2263 = vmatprep.mubr.msk.f32.mxu0 %vm2818_vm12, %v2815_v22  ;;  %vm1702_vm12 = vmor %vm1701_vm8, %vm1289_vm4 }
 0x550   : > { %v1518_v44 = vpop.permute.xlu0 %1517 }
 0x617   : > { %v1590_v48 = vpop.f32.mrb[2].mxu1 }
 0x618   : > { %v1591_v25 = vadd.f32 %v1590_v48, %v1518_v44  ;;  %v1592_v32 = vpop.f32.mrb[3].mxu1 }
 0x619   : > { %v1593_v14 = vadd.f32 %v1592_v32, %v1518_v44 }
 0x61a   : > { %v1665_v51 = vmax.f32 %v1591_v25, 0.0 }
 0x61b   : > { %v1666_v52 = vmax.f32 %v1593_v14, 0.0 }
 0x61c   : > { %v1685_v21 = vmul.f32 %v1673_v49, %v1665_v51  ;;  %v1661_v40 = vpop.f32.mrb[4].mxu0 }
 0x61d   : > { %v1686_v46 = vmul.f32 %v1677_v50, %v1666_v52  ;;  %v1662_v54 = vadd.f32 %v1661_v40, %v1518_v44  ;;  %v2252_v55 = vpop.f32.mrb[5].mxu0 }
 0x61f   : > { %v1691_v56 = vcombine.low %v1685_v21, %v1686_v46  ;;  %v1667_v57 = vmax.f32 %v1662_v54, 0.0 }
 0x621   : > { %1692 = vrot.lane.b32.xlu1 %v1691_v56, %s2817_s14  ;;  %v1687_v39 = vmul.f32 %v1681_v28, %v1667_v57 }
 0x625   : > { %1694 = vrot.lane.b32.xlu1 %v1687_v39, %s2817_s14 }
 0x693   : > { %v1693_v58 = vpop.permute.xlu1 %1692 }
 0x694   : > { %v1696_v59 = vrot.slane %v1693_v58, 4 }
 0x696   : > { %v1697_v38 = vsel %vm387_vm14, %v1696_v59, %v1693_v58 }
 0x697   : > { %1703 = vst.msk [vmem:[#allocation4] sm:$0xff] %vm1702_vm12, %v1697_v38  ;;  %v1695_v60 = vpop.permute.xlu1 %1694 }
 0x698   : > { %v1698_v61 = vsel %vm387_vm14, %v1696_v59, %v1695_v60  ;;  %vm1734_vm14 = vcmask 261124  }
 0x699   : > { %1704 = vst.msk [vmem:[#allocation4 + $0x8] sm:$0xf] %vm1292_vm7, %v1698_v61 }
 0x69e   : > { %v1706_v62 = vld [vmem:[#allocation4] sm:$0xff] }
 0x69f   : > { %v1709_v43 = vcombine.high %v1706_v62, %v1706_v62  ;;  %1711 = vst [vmem:[#allocation5] sm:$0xf] %v1706_v62  ;;  %1723 = vrot.lane.b32.xlu0 %v1706_v62, %s2789_s11  ;;  %v1719_v2 = vcombine.low %v1706_v62, %v1706_v62 }
 0x6a0   : > { %v1737_v63 = vld [vmem:[#allocation4 + $0x8] sm:$0xf] }
 0x6a1   : > { %1712 = vst [vmem:[#allocation5 + $0x8] sm:$0xf] %v1709_v43  ;;  %1745 = vrot.lane.b32.xlu1 %v1737_v63, %s2790_s26  ;;  %v1707_v0 = vld [vmem:[#allocation4 + $0x8] sm:$0xf] }
 0x6a2   : > { %1714 = vst.msk [vmem:[#allocation5 + $0x10] sm:$0xf] %vm1713_vm5, %v1707_v0  ;;  %v1776_v27 = vld [vmem:[#allocation4 + $0x8] sm:$0xf] }
 0x6a3   : > { %1763 = vrot.lane.b32.xlu0 %v1706_v62, %s2791_s20  ;;  %v1815_v1 = vld [vmem:[#allocation4 + $0x8] sm:$0xf] }
 0x6a4   : > { %v2549_v3 = vld [vmem:[#allocation4 + $0x8] ss:$0 sps:$4 sm:$0xff]  }
 0x6a5   : > { %1741 = vrot.lane.b32.xlu1 %v1706_v62, %s2790_s26  ;;  %v2550_v53 = vld [vmem:[#allocation4 + $0x8] ss:$0 sps:$4 sm:$0xff]  }
 0x6a6   : > { %v2551_v6 = vld [vmem:[#allocation4 + $0x8] ss:$0 sps:$4 sm:$0xff]  }
 0x6a7   : > { %1784 = vrot.lane.b32.xlu0 %v1776_v27, %s2800_s0  ;;  %v2552_v4 = vld [vmem:[#allocation4 + $0x8] ss:$0 sps:$4 sm:$0xff]  }
 0x6a8   : > { %v1854_v8 = vld [vmem:[#allocation4 + $0x8] sm:$0xf] }
 0x6a9   : > { %1802 = vrot.lane.b32.xlu1 %v1706_v62, %s2803_s2 }
 0x6ab   : > { %1823 = vrot.lane.b32.xlu0 %v1815_v1, %s2792_s21 }
 0x6ad   : > { %1841 = vrot.lane.b32.xlu1 %v1706_v62, %s2808_s24 }
 0x6af   : > { %1743 = vrot.lane.b32.xlu0 %v1709_v43, %s2790_s26 }
 0x6b1   : > { %1780 = vrot.lane.b32.xlu1 %v1706_v62, %s2800_s0 }
 0x6b3   : > { %1721 = vrot.lane.b32.xlu0 %v1719_v2, %s2789_s11 }
 0x6b5   : > { %1819 = vrot.lane.b32.xlu1 %v1706_v62, %s2792_s21 }
 0x6b7   : > { %1761 = vrot.lane.b32.xlu0 %v1719_v2, %s2791_s20 }
 0x6b9   : > { %1725 = vrot.lane.b32.xlu1 %v2549_v3, %s2789_s11 }
 0x6bb   : > { %1804 = vrot.lane.b32.xlu0 %v2550_v53, %s2803_s2 }
 0x6bd   : > { %1765 = vrot.lane.b32.xlu1 %v2551_v6, %s2791_s20 }
 0x6bf   : > { %1843 = vrot.lane.b32.xlu0 %v2552_v4, %s2808_s24 }
 0x6c1   : > { %1782 = vrot.lane.b32.xlu1 %v1709_v43, %s2800_s0  ;;  %s3560_s0 = smov 56  }
 0x6c3   : > { %1800 = vrot.lane.b32.xlu0 %v1719_v2, %s2803_s2 }
 0x6c5   : > { %1821 = vrot.lane.b32.xlu1 %v1709_v43, %s2792_s21  ;;  %s3561_s21 = smul.u32 12, %s3060_s18 }
 0x6c7   : > { %1839 = vrot.lane.b32.xlu0 %v1719_v2, %s2808_s24  ;;  %s386_s2 = scalar_lea.vmem [#allocation14], %s3561_s21  ;;  %s2370_s24 = smul.u32 192, %s2886_s9 }
 0x6c8   : > { %s2819_s9 = smov [#allocation14]  }
 0x6c9   : > { %1860 = vrot.lane.b32.xlu1 %v1709_v43, %s2811_s15  ;;  %s3480_s10 = scalar_lea.hbm %s3532_s8, %s2370_s24  ;;  %s2673_s13 = sshll.u32 %s2819_s9, 4  ;;  %s2674_s13 = int_to_ptr.vmem [resolvable:$false] %s2673_s13 }
 0x6ca   : > { %s2675_s23 = scalar_lea.vmem %s2674_s13, 384 }
 0x6cb   : > { %1862 = vrot.lane.b32.xlu0 %v1854_v8, %s2811_s15 }
 0x6cd   : > { %1858 = vrot.lane.b32.xlu1 %v1706_v62, %s2811_s15  ;;  %s2074_s15 = sshll.u32 %s386_s2, 4  ;;  %s3482_s15 = int_to_ptr.vmem [resolvable:$true] %s2074_s15 }
 0x6ce   : > { %s2669_s4 = scalar_lea.vmem %s3482_s15, 192  ;;  %p2676_p5 = scmp.lt.s32.totalorder %s3482_s15, %s2674_s13 }
 0x6cf   : > { %1894 = vrot.lane.b32.xlu0 %v1705_v9, %s3560_s0  ;;  %p2670_p3 = scmp.ne.s32.totalorder %s3482_s15, %s2669_s4  ;;  %p2677_p9 = scmp.lt.s32.totalorder %s2675_s23, %s2669_s4 }
 0x6d1   : > { %1890 = vperm.xlu1 %2545, %v1887_v11   ;;  %p2671_p10 = pnand %p2670_p3, %p3562_p7  ;;  %p2678_p1 = por %p2677_p9, %p2676_p5 }
 0x6d3   : > { %p2672_p13 = pneg %p2671_p10 }
 0x6d5   : > { %p2679_p6 = pnand %p2678_p1, %p2672_p13 }
 0x711   : > { %v1724_v13 = vpop.permute.xlu0 %1723 }
 0x713   : > { %v1746_v15 = vpop.permute.xlu1 %1745 }
 0x714   : > { %1754 = vst.msk [vmem:[#allocation5 + $0x28] sm:$0xf] %vm1713_vm5, %v1746_v15 }
 0x715   : > { %v1764_v16 = vpop.permute.xlu0 %1763 }
 0x717   : > { %v1742_v5 = vpop.permute.xlu1 %1741 }
 0x719   : > { %v1785_v17 = vpop.permute.xlu0 %1784 }
 0x71a   : > { %1793 = vst.msk [vmem:[#allocation5 + $0x40] sm:$0xf] %vm1713_vm5, %v1785_v17 }
 0x71b   : > { %v1803_v18 = vpop.permute.xlu1 %1802 }
 0x71d   : > { %v1824_v10 = vpop.permute.xlu0 %1823 }
 0x71e   : > { %1832 = vst.msk [vmem:[#allocation5 + $0x58] sm:$0xf] %vm1713_vm5, %v1824_v10 }
 0x71f   : > { %v1842_v20 = vpop.permute.xlu1 %1841 }
 0x721   : > { %v1744_v19 = vpop.permute.xlu0 %1743 }
 0x722   : > { %v1747_v24 = vsel %vm453_vm2, %v1742_v5, %v1744_v19  ;;  %v1748_v23 = vsel %vm453_vm2, %v1744_v19, %v1746_v15 }
 0x723   : > { %1752 = vst [vmem:[#allocation5 + $0x18] sm:$0xf] %v1747_v24  ;;  %1753 = vst [vmem:[#allocation5 + $0x20] sm:$0xf] %v1748_v23  ;;  %v1781_v29 = vpop.permute.xlu1 %1780 }
 0x725   : > { %v1722_v12 = vpop.permute.xlu0 %1721 }
 0x726   : > { %v1727_v30 = vsel %vm436_vm0, %v1722_v12, %v1724_v13 }
 0x727   : > { %1732 = vst [vmem:[#allocation5] sm:$0xf0] %v1727_v30  ;;  %v1820_v31 = vpop.permute.xlu1 %1819 }
 0x729   : > { %v1762_v37 = vpop.permute.xlu0 %1761 }
 0x72a   : > { %v1767_v33 = vsel %vm470_vm1, %v1762_v37, %v1764_v16 }
 0x72b   : > { %1772 = vst [vmem:[#allocation5 + $0x18] sm:$0xf0] %v1767_v33  ;;  %v1726_v34 = vpop.permute.xlu1 %1725 }
 0x72c   : > { %v1728_v26 = vsel %vm436_vm0, %v1724_v13, %v1726_v34  ;;  %1735 = vst.msk [vmem:[#allocation5 + $0x10] sm:$0xf0] %vm1734_vm14, %v1726_v34  ;;  %vm1899_vm0 = vcmask 1043456  }
 0x72d   : > { %1733 = vst [vmem:[#allocation5 + $0x8] sm:$0xf0] %v1728_v26  ;;  %v1805_v35 = vpop.permute.xlu0 %1804 }
 0x72e   : > { %v1807_v36 = vsel %vm504_vm13, %v1803_v18, %v1805_v35  ;;  %1813 = vst.msk [vmem:[#allocation5 + $0x40] sm:$0xf0] %vm1734_vm14, %v1805_v35  ;;  %v1872_v28 = vld [vmem:[#allocation5] sm:$0xff] }
 0x72f   : > { %1812 = vst [vmem:[#allocation5 + $0x38] sm:$0xf0] %v1807_v36  ;;  %v1766_v41 = vpop.permute.xlu1 %1765 }
 0x730   : > { %v1768_v44 = vsel %vm470_vm1, %v1764_v16, %v1766_v41  ;;  %1774 = vst.msk [vmem:[#allocation5 + $0x28] sm:$0xf0] %vm1734_vm14, %v1766_v41  ;;  %vm1896_vm1 = vcmask 293888  }
 0x731   : > { %1773 = vst [vmem:[#allocation5 + $0x20] sm:$0xf0] %v1768_v44  ;;  %v1844_v45 = vpop.permute.xlu0 %1843 }
 0x732   : > { %v1846_v47 = vsel %vm538_vm6, %v1842_v20, %v1844_v45  ;;  %1852 = vst.msk [vmem:[#allocation5 + $0x58] sm:$0xf0] %vm1734_vm14, %v1844_v45  ;;  %v1875_v7 = vld [vmem:[#allocation5 + $0x18] sm:$0xff] }
 0x733   : > { %1851 = vst [vmem:[#allocation5 + $0x50] sm:$0xf0] %v1846_v47  ;;  %v1783_v48 = vpop.permute.xlu1 %1782  ;;  %v1874_v51 = vld [vmem:[#allocation5 + $0x10] sm:$0xff]  ;;  %v2352_v59 = vpack.c.bf16 %v1875_v7, %v1872_v28 }
 0x734   : > { %v1786_v25 = vsel %vm487_vm10, %v1781_v29, %v1783_v48  ;;  %v1787_v49 = vsel %vm487_vm10, %v1783_v48, %v1785_v17  ;;  %v1873_v54 = vld [vmem:[#allocation5 + $0x8] sm:$0xff] }
 0x735   : > { %1791 = vst [vmem:[#allocation5 + $0x30] sm:$0xf] %v1786_v25  ;;  %1792 = vst [vmem:[#allocation5 + $0x38] sm:$0xf] %v1787_v49  ;;  %v1801_v32 = vpop.permute.xlu0 %1800  ;;  %v1880_v60 = vld [vmem:[#allocation5 + $0x40] sm:$0xff] }
 0x736   : > { %v1806_v14 = vsel %vm504_vm13, %v1801_v32, %v1803_v18 }
 0x737   : > { %1811 = vst [vmem:[#allocation5 + $0x30] sm:$0xf0] %v1806_v14  ;;  %v1822_v50 = vpop.permute.xlu1 %1821  ;;  %v1877_v52 = vld [vmem:[#allocation5 + $0x28] sm:$0xff] }
 0x738   : > { %v1825_v21 = vsel %vm521_vm3, %v1820_v31, %v1822_v50  ;;  %v1826_v40 = vsel %vm521_vm3, %v1822_v50, %v1824_v10  ;;  %v2359_v46 = vpack.c.bf16 %v1877_v52, %v1874_v51  ;;  %v1876_v55 = vld [vmem:[#allocation5 + $0x20] sm:$0xff] }
 0x739   : > { %1830 = vst [vmem:[#allocation5 + $0x48] sm:$0xf] %v1825_v21  ;;  %1831 = vst [vmem:[#allocation5 + $0x50] sm:$0xf] %v1826_v40  ;;  %v1840_v56 = vpop.permute.xlu0 %1839  ;;  %v2350_v57 = vpack.c.bf16 %v1876_v55, %v1873_v54  ;;  %v1883_v39 = vld [vmem:[#allocation5 + $0x58] sm:$0xff] }
 0x73a   : > { %v1845_v58 = vsel %vm538_vm6, %v1840_v56, %v1842_v20  ;;  %2360 = vmatpush3.bf16.msra.mxu0 %v2359_v46  ;;  %v2362_v61 = vpack.c.bf16 %v1883_v39, %v1880_v60 }
 0x73b   : > { %1850 = vst [vmem:[#allocation5 + $0x48] sm:$0xf0] %v1845_v58  ;;  %2351 = vmatprep.subr.bf16.mxu1 %v2350_v57  ;;  %v1861_v38 = vpop.permute.xlu1 %1860  ;;  %2361 = vmatprep.subr.bf16.mxu0 %v2816_v42 }
 0x73c   : > { %2353 = vmatpush1.bf16.msra.mxu1 %v2352_v59  ;;  %v1879_v27 = vld [vmem:[#allocation5 + $0x38] sm:$0xff] }
 0x73d   : > { %v1863_v62 = vpop.permute.xlu0 %1862 }
 0x73e   : > { %v1865_v43 = vsel %vm555_vm11, %v1861_v38, %v1863_v62  ;;  %1871 = vst.msk [vmem:[#allocation5 + $0x70] sm:$0xf] %vm1713_vm5, %v1863_v62  ;;  %2363 = vmatpush3.bf16.msra.mxu0 %v2362_v61  ;;  %v1878_v42 = vld [vmem:[#allocation5 + $0x30] sm:$0xff] }
 0x73f   : > { %1870 = vst [vmem:[#allocation5 + $0x68] sm:$0xf] %v1865_v43  ;;  %v1859_v63 = vpop.permute.xlu1 %1858  ;;  %2261 = vmatprep.subr.mxu0 %v2815_v22 }
 0x740   : > { %v1864_v0 = vsel %vm555_vm11, %v1859_v63, %v1861_v38  ;;  %v1882_v1 = vld [vmem:[#allocation5 + $0x50] sm:$0xff] }
 0x741   : > { %1869 = vst [vmem:[#allocation5 + $0x60] sm:$0xf] %v1864_v0  ;;  %v2354_v2 = vpack.c.bf16 %v1882_v1, %v1879_v27  ;;  %v1895_v6 = vpop.permute.xlu0 %1894 }
 0x742   : > { %v1881_v3 = vld [vmem:[#allocation5 + $0x48] sm:$0xff] }
 0x743   : > { %2355 = vmatprep.subr.bf16.mxu1 %v2354_v2  ;;  %v2356_v53 = vpack.c.bf16 %v1881_v3, %v1878_v42 }
 0x745   : > { %2357 = vmatpush1.bf16.msra.mxu1 %v2356_v53  ;;  %v1886_v4 = vld [vmem:[#allocation5 + $0x70] sm:$0xf] }
 0x746   : > { %2262 = vmatpush3.msk.msra.mxu0 %vm1899_vm0, %v1886_v4  ;;  %v1885_v8 = vld [vmem:[#allocation5 + $0x68] sm:$0xf] }
 0x747   : > { %2208 = vmatprep.subr.msk.mxu1 %vm1899_vm0, %v1885_v8  ;;  %2264 = vmatmul.mubr.msk.f32.vlgmr.msra.gmra.mrb[6].mxu0 %vm1896_vm1, %v1895_v6 }
 0x748   : > { %v1884_v22 = vld [vmem:[#allocation5 + $0x60] sm:$0xf] }
 0x749   : > { %2209 = vmatpush1.msk.msra.mxu1 %vm1899_vm0, %v1884_v22 }
 0x74a   : > { %2210 = vmatmul.mubr.msk.f32.vlgmr.msra.gmra.mrb[4].mxu1 %vm1896_vm1, %v1895_v6 }
 0x750   : > { %v1891_v9 = vpop.permute.xlu1 %1890 }
 0x81a   : > { %v2046_v11 = vpop.f32.mrb[6].mxu0 }
 0x81b   : > { %v2047_v13 = vadd.f32 %v2046_v11, %v1891_v9  ;;  %v2265_v15 = vpop.f32.mrb[7].mxu0 }
 0x81d   : > { %v1975_v16 = vpop.f32.mrb[4].mxu1  ;;  %v2052_v5 = vmax.f32 %v2047_v13, 0.0 }
 0x81e   : > { %v1976_v17 = vadd.f32 %v1975_v16, %v1891_v9  ;;  %v1977_v18 = vpop.f32.mrb[5].mxu1 }
 0x81f   : > { %v1978_v10 = vadd.f32 %v1977_v18, %v1891_v9  ;;  %2058 = vst.msk [vmem:[%s386_s2 + $0x8] sm:$0xf] %vm1713_vm5, %v2052_v5 }
 0x820   : > { %v2050_v20 = vmax.f32 %v1976_v17, 0.0 }
 0x821   : > { %v2051_v19 = vmax.f32 %v1978_v10, 0.0 }
 0x823   : > { %v2055_v24 = vcombine.low %v2050_v20, %v2051_v19 }
 0x825   : > { %2057 = vst [vmem:[%s386_s2] sm:$0xff] %v2055_v24 }
 0x826   : > { %2682 = shalt.err (!%p2679_p6)
}
 0x827   : > { %s2683_s18 = scalar_lea.hbm %s3480_s10, 192  ;;  %s2687_s20 = scalar_lea.hbm %s3532_s8, 384 }
 0x828   : > { %p2684_p2 = scmp.ne.s32.totalorder %s3480_s10, %s2683_s18  ;;  %p2688_p0 = scmp.lt.u32.totalorder %s3480_s10, %s3532_s8 }
 0x829   : > { %p2689_p8 = scmp.lt.u32.totalorder %s2687_s20, %s2683_s18  ;;  %p2691_p3 = scmp.lt.u32.totalorder %s2683_s18, %s3480_s10 }
 0x82a   : > { %p2685_p4 = pnand %p2684_p2, %p3562_p7 }
 0x82b   : > { %p2690_p12 = por %p2689_p8, %p2688_p0 }
 0x82c   : > { %p2686_p11 = pneg %p2685_p4 }
 0x82d   : > { %p2692_p10 = por %p2691_p3, %p2690_p12 }
 0x82f   : > { %p2693_p13 = pnand %p2692_p10, %p2686_p11 }
 0x831   : > { %2696 = shalt.err (!%p2693_p13)
}
 0x832   : > { %2383 = dma.vmem_to_hbm [thread:$0]  (%p3562_p7), %s3482_s15, 192, %s3480_s10, %s2060_s17  }
 0x833 PF: > { %s2086_s21 = sand.u32 1, %s2735_s27   ;;  %p3563_p5 = scmp.ne.s32.totalorder %s3543_s12, 0 }
 0x834   : > { %p3564_p9 = scmp.ge.s32.totalorder %s2747_s30, 2  ;;  %s2087_s2 = scalar_lea.sflag [#allocation8], %s2086_s21 }
 0x836   : > { %p2400_p1 = pnand %p3564_p9, %p3563_p5 }
 0x838   : > { %2730 = dma.done.wait (!%p2400_p1), %s2087_s2, 192  }
 0x839   : > { %2732 = vsyncadd (!%p2400_p1), %s2087_s2, 4294967104  ;;  %s3565_s24 = sld [smem:[#allocation20_spill]]  ;;  %p25_p6 = scmp.ge.s32.totalorder %s2968_s19, 4  }
 0x83a   : > { %s3566_s27 = smov %s2739_s28  ;;  %s3567_s28 = smov %s2743_s29 }
 0x83b   : > { %s3569_s30 = smov %s2968_s19  ;;  %27 = sbr.rel (!%p25_p6) target bundleno = 12 (0xc), region = 125 }
 0x83f   : > { %s3568_s29 = smov %s3565_s24 }
 0x842   :  { %2092 = vsyncpa [#allocation7], 1 }
 0x843   :  { %2094 = vsyncpa [#allocation7 + $0x1], 1 }
 0x844   :  { %2095 = vsyncpa [#allocation10], 1 }
 0x845   :  { %2097 = vsyncpa [#allocation10 + $0x1], 1 }
 0x846   :  { %2098 = vsyncpa [#allocation13], 1 }
 0x847   :  { %2099 = vsyncpa [#allocation8], 1 }
 0x848   :  { %2101 = vsyncpa [#allocation8 + $0x1], 1 }

</bundles_post_ra>
